<compile_context>
chip_gen: v6e
topology: v6e:2x2x1
jax: 0.10.0
libtpu: 0.0.40
codegen_flags: <defaults>
</compile_context>

<pallas_src>
import jax
import jax.numpy as jnp
from jax.experimental import pallas as pl
from jax.experimental.pallas import tpu as pltpu


def _mhfe_kernel(p_ref, w1_ref, b1_ref, w2_ref, b2_ref, out_ref):
    """Fused conv(3x3, SAME) -> ReLU -> global-avg-pool -> linear, Nb samples.

    p_ref  : (Nb, HW, 9C)   im2col patches; lane axis = 9C, ordered (kh, kw, c)
    w1_ref : (9C, hidden)   conv weight rows ordered (kh, kw, c)
    b1_ref : (1, hidden)    conv bias
    w2_ref : (hidden, Fp)   linear weight, F zero-padded to 128 lanes
    b2_ref : (1, Fp)        linear bias (zero-padded)
    out_ref: (1, Nb, Fp)    per-sample features (lane-dense, unmasked stores)
    """
    Nb, HW, K = p_ref.shape
    hidden = w1_ref.shape[-1]

    # One K=9C conv matmul covering all Nb*HW spatial positions.  Both reshapes
    # are layout no-ops (HW is a multiple of the 8-row sublane tile).
    p = p_ref[...].reshape(Nb * HW, K)
    h = jnp.dot(p, w1_ref[...], preferred_element_type=jnp.float32)
    h = jnp.maximum(h + b1_ref[...], 0.0)                       # (Nb*HW, hidden)

    # Global average pool over the HW positions of each sample (XLU reduce).
    pooled = jnp.mean(h.reshape(Nb, HW, hidden), axis=1)        # (Nb, hidden)

    # Batched linear head; output is already lane-dense (Fp = 128).
    y = jnp.dot(pooled, w2_ref[...],
                preferred_element_type=jnp.float32) + b2_ref[...]
    out_ref[0] = y.astype(out_ref.dtype)                        # (Nb, Fp)


def _tensorcores_per_chip() -> int:
    """Best-effort: v7x has 2 TensorCores per chip, v5e/v6e have 1.  A wrong
    guess only changes the tiling choice, never correctness."""
    try:
        kind = jax.devices()[0].device_kind.lower()
    except Exception:
        return 1
    return 2 if ("v7" in kind or "7x" in kind) else 1


def _choose_block(n, per_sample_bytes, n_cores, vmem_budget):
    """Pick (Nb, G): as many samples per grid step as the VMEM budget allows.
    Single-TC chips get the fewest possible grid steps; multi-TC chips get a
    grid rounded up to a multiple of the core count so "parallel" balances."""
    cap = max(1, vmem_budget // max(per_sample_bytes, 1))
    g = pl.cdiv(n, min(cap, n))
    if n_cores > 1 and n > 1:
        g = max(g, n_cores)
        g = pl.cdiv(g, n_cores) * n_cores
    nb = pl.cdiv(n, g)
    g = pl.cdiv(n, nb)
    if n_cores > 1 and n > 1:
        g = pl.cdiv(g, n_cores) * n_cores
    return nb, g


def multi_head_feature_extractor(X, w_conv, b_conv, w_fc, b_fc):
    """X: (B, Hd, C, H, W) float32.  Returns (B, Hd * feature_size)."""
    B, Hd, C, H, W = X.shape
    hidden = w_conv.shape[0]
    F = w_fc.shape[0]
    N = B * Hd
    HW = H * W
    K9 = 9 * C
    Fp = pl.cdiv(F, 128) * 128

    # --- single layout-prep pass (torch movedim/reshape fold + im2col) -------
    # n = b*Hd + hd, matching the PyTorch movedim/reshape chain.
    x = jnp.transpose(X.reshape(N, C, H, W), (0, 2, 3, 1))       # (N, H, W, C)
    xp = jnp.pad(x, ((0, 0), (1, 1), (1, 1), (0, 0)))            # (N, H+2, W+2, C)
    taps = [xp[:, kh:kh + H, kw:kw + W, :]
            for kh in range(3) for kw in range(3)]
    patches = jnp.concatenate(taps, axis=-1).reshape(N, HW, K9)  # (N, HW, 9C)

    # --- parameters in kernel layout ------------------------------------------
    w1 = jnp.transpose(w_conv, (2, 3, 1, 0)).reshape(K9, hidden)  # [(kh*3+kw)*C+c, o]
    b1 = b_conv.reshape(1, hidden)
    w2 = jnp.pad(w_fc.T, ((0, 0), (0, Fp - F)))                   # (hidden, Fp)
    b2 = jnp.pad(b_fc.reshape(1, F), ((0, 0), (0, Fp - F)))       # (1, Fp)

    # --- block size: budget counts the double-buffered input block AND the
    #     in-kernel (Nb*HW, hidden) activation (both lane-padded to 128) -------
    lane = lambda d: pl.cdiv(d, 128) * 128
    per_sample = HW * (2 * lane(K9) + 2 * lane(hidden)) * 4 + 2 * Fp * 4
    n_cores = _tensorcores_per_chip()
    Nb, G = _choose_block(N, per_sample, n_cores, vmem_budget=16 << 20)

    # Zero-padded tail block instead of shrinking Nb for awkward N.
    Np = G * Nb
    if Np > N:
        patches = jnp.pad(patches, ((0, Np - N), (0, 0), (0, 0)))

    out = pl.pallas_call(
        _mhfe_kernel,
        out_shape=jax.ShapeDtypeStruct((G, Nb, Fp), jnp.float32),
        grid=(G,),
        in_specs=[
            pl.BlockSpec((Nb, HW, K9), lambda g: (g, 0, 0)),
            pl.BlockSpec((K9, hidden), lambda g: (0, 0)),
            pl.BlockSpec((1, hidden), lambda g: (0, 0)),
            pl.BlockSpec((hidden, Fp), lambda g: (0, 0)),
            pl.BlockSpec((1, Fp), lambda g: (0, 0)),
        ],
        out_specs=pl.BlockSpec((1, Nb, Fp), lambda g: (g, 0, 0)),
        compiler_params=pltpu.CompilerParams(
            dimension_semantics=("parallel",),
            # >= every generation's scoped default (raises v5e's 16 MiB),
            # safely below v7x's 64 MiB physical VMEM.
            vmem_limit_bytes=32 << 20,
        ),
    )(patches, w1, b1, w2, b2)

    feat = out.reshape(Np, Fp)[:N, :F]            # (N, F), n = b*Hd + hd
    # Torch movedim/reshape epilogue: out[b, hd*F + f] = feat[b*Hd + hd, f].
    return feat.reshape(B, Hd * F)


def _reference(X, w_conv, b_conv, w_fc, b_fc):
    """Pure-JAX reference mirroring the PyTorch semantics."""
    B, Hd, C, H, W = X.shape
    F = w_fc.shape[0]
    x = X.reshape(B * Hd, C, H, W)
    y = jax.lax.conv_general_dilated(
        x, w_conv, window_strides=(1, 1), padding="SAME",
        dimension_numbers=("NCHW", "OIHW", "NCHW"))
    y = y + b_conv[None, :, None, None]
    y = jnp.maximum(y, 0.0)
    pooled = jnp.mean(y, axis=(2, 3))                           # (N, hidden)
    feat = pooled @ w_fc.T + b_fc                               # (N, F)
    return feat.reshape(B, Hd * F)


if __name__ == "__main__":
    # Small, deterministic shapes: batch=2, heads=3, channels=4, 16x16 spatial,
    # hidden conv channels=32, feature_size=8.
    B, Hd, C, H, W = 2, 3, 4, 16, 16
    hidden, feature_size = 32, 8

    key = jax.random.PRNGKey(0)
    kx, kw1, kb1, kw2, kb2 = jax.random.split(key, 5)
    X = jax.random.normal(kx, (B, Hd, C, H, W), dtype=jnp.float32)
    w_conv = 0.1 * jax.random.normal(kw1, (hidden, C, 3, 3), dtype=jnp.float32)
    b_conv = 0.1 * jax.random.normal(kb1, (hidden,), dtype=jnp.float32)
    w_fc = 0.1 * jax.random.normal(kw2, (feature_size, hidden), dtype=jnp.float32)
    b_fc = 0.1 * jax.random.normal(kb2, (feature_size,), dtype=jnp.float32)

    out = multi_head_feature_extractor(X, w_conv, b_conv, w_fc, b_fc)
    out = jax.block_until_ready(out)

    ref = _reference(X, w_conv, b_conv, w_fc, b_fc)
    assert out.shape == (B, Hd * feature_size), out.shape
    err = float(jnp.max(jnp.abs(out - ref)))
    assert jnp.allclose(out, ref, rtol=1e-4, atol=1e-4), err

    print("KERNEL_OK")
</pallas_src>

<mosaic_0001>
module attributes {stable_mosaic.version = 11 : i64} {
  func.func @_mhfe_kernel(%arg0: i32, %arg1: memref<6x256x36xf32, #tpu.memory_space<vmem>>, %arg2: memref<36x32xf32, #tpu.memory_space<vmem>>, %arg3: memref<1x32xf32, #tpu.memory_space<vmem>>, %arg4: memref<32x128xf32, #tpu.memory_space<vmem>>, %arg5: memref<1x128xf32, #tpu.memory_space<vmem>>, %arg6: memref<1x6x128xf32, #tpu.memory_space<vmem>>) attributes {dimension_semantics = [#tpu.dimension_semantics<parallel>], iteration_bounds = array<i64: 1>, scalar_prefetch = 0 : i64, scratch_operands = 0 : i64, tpu.core_type = #tpu.core_type<tc>, window_params = [{transform_indices = @transform_0, window_bounds = array<i64: 6, 256, 36>}, {pipeline_mode = #tpu.pipeline_mode<synchronous>, transform_indices = @transform_1, window_bounds = array<i64: 36, 32>}, {pipeline_mode = #tpu.pipeline_mode<synchronous>, transform_indices = @transform_2, window_bounds = array<i64: 1, 32>}, {pipeline_mode = #tpu.pipeline_mode<synchronous>, transform_indices = @transform_3, window_bounds = array<i64: 32, 128>}, {pipeline_mode = #tpu.pipeline_mode<synchronous>, transform_indices = @transform_4, window_bounds = array<i64: 1, 128>}, {transform_indices = @transform_5, window_bounds = array<i64: 1, 6, 128>}]} {
    %c0 = arith.constant 0 : index
    %c0_0 = arith.constant 0 : index
    %c0_1 = arith.constant 0 : index
    %0 = vector.load %arg1[%c0, %c0_0, %c0_1] : memref<6x256x36xf32, #tpu.memory_space<vmem>>, vector<6x256x36xf32>
    %1 = vector.shape_cast %0 : vector<6x256x36xf32> to vector<1536x36xf32>
    %c0_2 = arith.constant 0 : index
    %c0_3 = arith.constant 0 : index
    %2 = vector.load %arg2[%c0_2, %c0_3] : memref<36x32xf32, #tpu.memory_space<vmem>>, vector<36x32xf32>
    %cst = arith.constant dense<0.000000e+00> : vector<1536x32xf32>
    %3 = tpu.matmul %1, %2, %cst {dimension_numbers = #tpu.dot_dimension_numbers<[1], [0], [0], [1], [0, 0, 1, 1], [], []>} : vector<1536x36xf32>, vector<36x32xf32>, vector<1536x32xf32> -> vector<1536x32xf32>
    %c0_4 = arith.constant 0 : index
    %c0_5 = arith.constant 0 : index
    %4 = vector.load %arg3[%c0_4, %c0_5] : memref<1x32xf32, #tpu.memory_space<vmem>>, vector<1x32xf32>
    %5 = vector.broadcast %4 : vector<1x32xf32> to vector<1536x32xf32>
    %6 = arith.addf %3, %5 : vector<1536x32xf32>
    %cst_6 = arith.constant 0.000000e+00 : f32
    %7 = vector.broadcast %cst_6 : f32 to vector<1536x32xf32>
    %8 = arith.maximumf %6, %7 : vector<1536x32xf32>
    %9 = vector.shape_cast %8 : vector<1536x32xf32> to vector<6x256x32xf32>
    %cst_7 = arith.constant dense<0.000000e+00> : vector<6x32xf32>
    %10 = vector.multi_reduction <add>, %9, %cst_7 [1] : vector<6x256x32xf32> to vector<6x32xf32>
    %cst_8 = arith.constant 2.560000e+02 : f32
    %11 = vector.broadcast %cst_8 : f32 to vector<6x32xf32>
    %12 = arith.divf %10, %11 : vector<6x32xf32>
    %c0_9 = arith.constant 0 : index
    %c0_10 = arith.constant 0 : index
    %13 = vector.load %arg4[%c0_9, %c0_10] : memref<32x128xf32, #tpu.memory_space<vmem>>, vector<32x128xf32>
    %cst_11 = arith.constant dense<0.000000e+00> : vector<6x128xf32>
    %14 = tpu.matmul %12, %13, %cst_11 {dimension_numbers = #tpu.dot_dimension_numbers<[1], [0], [0], [1], [0, 0, 1, 1], [], []>} : vector<6x32xf32>, vector<32x128xf32>, vector<6x128xf32> -> vector<6x128xf32>
    %c0_12 = arith.constant 0 : index
    %c0_13 = arith.constant 0 : index
    %15 = vector.load %arg5[%c0_12, %c0_13] : memref<1x128xf32, #tpu.memory_space<vmem>>, vector<1x128xf32>
    %16 = vector.broadcast %15 : vector<1x128xf32> to vector<6x128xf32>
    %17 = arith.addf %14, %16 : vector<6x128xf32>
    %c0_14 = arith.constant 0 : index
    %c0_15 = arith.constant 0 : index
    %c0_16 = arith.constant 0 : index
    %18 = vector.load %arg6[%c0_14, %c0_15, %c0_16] : memref<1x6x128xf32, #tpu.memory_space<vmem>>, vector<1x6x128xf32>
    %19 = vector.shape_cast %18 : vector<1x6x128xf32> to vector<6x128xf32>
    %20 = vector.shape_cast %17 : vector<6x128xf32> to vector<1x6x128xf32>
    tpu.vector_store %arg6[%c0_14, %c0_15, %c0_16], %20 {strides = array<i32>} : memref<1x6x128xf32, #tpu.memory_space<vmem>>, vector<1x6x128xf32>,
    return
  }
  func.func @transform_0(%arg0: i32) -> (i32, i32, i32) {
    %c0_i32 = arith.constant 0 : i32
    %c0_i32_0 = arith.constant 0 : i32
    %c0_i32_1 = arith.constant 0 : i32
    return %arg0, %c0_i32, %c0_i32_0 : i32, i32, i32
  }
  func.func @transform_1(%arg0: i32) -> (i32, i32) {
    %c0_i32 = arith.constant 0 : i32
    %c0_i32_0 = arith.constant 0 : i32
    %c0_i32_1 = arith.constant 0 : i32
    return %c0_i32, %c0_i32_0 : i32, i32
  }
  func.func @transform_2(%arg0: i32) -> (i32, i32) {
    %c0_i32 = arith.constant 0 : i32
    %c0_i32_0 = arith.constant 0 : i32
    %c0_i32_1 = arith.constant 0 : i32
    return %c0_i32, %c0_i32_0 : i32, i32
  }
  func.func @transform_3(%arg0: i32) -> (i32, i32) {
    %c0_i32 = arith.constant 0 : i32
    %c0_i32_0 = arith.constant 0 : i32
    %c0_i32_1 = arith.constant 0 : i32
    return %c0_i32, %c0_i32_0 : i32, i32
  }
  func.func @transform_4(%arg0: i32) -> (i32, i32) {
    %c0_i32 = arith.constant 0 : i32
    %c0_i32_0 = arith.constant 0 : i32
    %c0_i32_1 = arith.constant 0 : i32
    return %c0_i32, %c0_i32_0 : i32, i32
  }
  func.func @transform_5(%arg0: i32) -> (i32, i32, i32) {
    %c0_i32 = arith.constant 0 : i32
    %c0_i32_0 = arith.constant 0 : i32
    %c0_i32_1 = arith.constant 0 : i32
    return %arg0, %c0_i32, %c0_i32_0 : i32, i32, i32
  }
}

</mosaic_0001>

<bundles_post_ra>
// kernel: tpu_custom_call.1
= control target key start
LH: loop header
LB: loop body
LE: loop exit
PB: predicated region body
PF: predicated region fallthrough
CT: control target
= control target key end

     0   :  { %vm801_vm0 = vcmask 1043456   ;;  %vm224_vm1 = vcmask 293888   ;;  %vm2022_vm2 = vcmask 261120   ;;  %vm2461_vm3 = vcmask 1041409   ;;  %s4612_s1 = inlined_call_operand.vmem [shape: f32[36,32], index: 1, kind: input, shape index: {}]   ;;  %s4613_s0 = inlined_call_operand.vmem [shape: f32[6,256,36], index: 0, kind: input, shape index: {}]   ;;  %s4614_s3 = inlined_call_operand.vmem [shape: f32[32,128], index: 3, kind: input, shape index: {}]   ;;  %s4615_s2 = inlined_call_operand.vmem [shape: f32[1,32], index: 2, kind: input, shape index: {}]   ;;  %s4616_s4 = inlined_call_operand.vmem [shape: f32[1,128], index: 4, kind: input, shape index: {}]   ;;  %s4617_s5 = inlined_call_operand.vmem [shape: f32[1,6,128], index: 5, kind: output, shape index: {}]  }
   0x1   :  { %v216_v0 = vld [vmem:[%s4612_s1 + $0x20] sm:$0xf]  ;;  %v215_v1 = vld [vmem:[%s4612_s1 + $0x18] sm:$0xff]  ;;  %v214_v3 = vld [vmem:[%s4612_s1 + $0x10] sm:$0xff]  ;;  %vm3269_vm4 = vmmov 0   ;;  %vm2463_vm5 = vcmask 1042434  }
   0x2   :  { %2946 = vmatprep.subr.msk.mxu0 %vm801_vm0, %v216_v0  ;;  %v20_v2 = vld [vmem:[%s4613_s0] sm:$0xff]  ;;  %3255 = vmatprep.subr.msk.mxu1 %vm801_vm0, %v216_v0  ;;  %v213_v4 = vld [vmem:[%s4612_s1 + $0x8] sm:$0xff]  ;;  %v22_v7 = vld [vmem:[%s4613_s0 + $0x10] sm:$0xff]  ;;  %vm2465_vm6 = vcmask 1043459   ;;  %vm2467_vm7 = vcmask 1044484   ;;  %vm2469_vm8 = vcmask 1045509  }
   0x3   :  { %2947 = vmatpush3.msk.msra.mxu0 %vm801_vm0, %v216_v0  ;;  %2956 = vmatprep.mubr.msk.f32.mxu0 %vm224_vm1, %v20_v2  ;;  %v212_v5 = vld [vmem:[%s4612_s1] sm:$0xff]  ;;  %v21_v6 = vld [vmem:[%s4613_s0 + $0x8] sm:$0xff]  ;;  %v118_v8 = vld [vmem:[%s4613_s0 + $0x310] sm:$0xff] }
   0x4   :  { %2948 = vmatprep.subr.mxu0 %v215_v1  ;;  %3260 = vmatpush3.msk.msra.mxu1 %vm801_vm0, %v216_v0  ;;  %v23_v9 = vld [vmem:[%s4613_s0 + $0x18] sm:$0xff]  ;;  %v24_v11 = vld [vmem:[%s4613_s0 + $0x20] sm:$0xff]  ;;  %v121_v13 = vld [vmem:[%s4613_s0 + $0x328] sm:$0xff] }
   0x5   :  { %2949 = vmatpush3.msra.mxu0 %v215_v1  ;;  %3256 = vmatprep.subr.mxu1 %v215_v1  ;;  %v119_v10 = vld [vmem:[%s4613_s0 + $0x318] sm:$0xff]  ;;  %v120_v12 = vld [vmem:[%s4613_s0 + $0x320] sm:$0xff]  ;;  %v122_v14 = vld [vmem:[%s4613_s0 + $0x330] sm:$0xff] }
   0x6   :  { %2950 = vmatprep.subr.mxu0 %v214_v3  ;;  %3261 = vmatpush3.msra.mxu1 %v215_v1  ;;  %v25_v15 = vld [vmem:[%s4613_s0 + $0x28] sm:$0xff]  ;;  %v26_v16 = vld [vmem:[%s4613_s0 + $0x30] sm:$0xff]  ;;  %v123_v17 = vld [vmem:[%s4613_s0 + $0x338] sm:$0xff] }
   0x7   :  { %2951 = vmatpush3.msra.mxu0 %v214_v3  ;;  %3257 = vmatprep.subr.mxu1 %v214_v3  ;;  %v124_v18 = vld [vmem:[%s4613_s0 + $0x340] sm:$0xff]  ;;  %v27_v19 = vld [vmem:[%s4613_s0 + $0x38] sm:$0xff]  ;;  %v125_v21 = vld [vmem:[%s4613_s0 + $0x348] sm:$0xff] }
   0x8   :  { %2952 = vmatprep.subr.mxu0 %v213_v4  ;;  %3262 = vmatpush3.msra.mxu1 %v214_v3  ;;  %v28_v20 = vld [vmem:[%s4613_s0 + $0x40] sm:$0xff]  ;;  %v126_v22 = vld [vmem:[%s4613_s0 + $0x350] sm:$0xff]  ;;  %v29_v23 = vld [vmem:[%s4613_s0 + $0x48] sm:$0xff] }
   0x9   :  { %2953 = vmatpush3.msra.mxu0 %v213_v4  ;;  %3258 = vmatprep.subr.mxu1 %v213_v4  ;;  %v30_v24 = vld [vmem:[%s4613_s0 + $0x50] sm:$0xff]  ;;  %v127_v25 = vld [vmem:[%s4613_s0 + $0x358] sm:$0xff]  ;;  %v128_v26 = vld [vmem:[%s4613_s0 + $0x360] sm:$0xff] }
   0xa   :  { %2954 = vmatprep.subr.mxu0 %v212_v5  ;;  %3263 = vmatpush3.msra.mxu1 %v213_v4  ;;  %v31_v27 = vld [vmem:[%s4613_s0 + $0x58] sm:$0xff]  ;;  %v32_v28 = vld [vmem:[%s4613_s0 + $0x60] sm:$0xff]  ;;  %v129_v29 = vld [vmem:[%s4613_s0 + $0x368] sm:$0xff] }
   0xb   :  { %2955 = vmatpush3.msra.mxu0 %v212_v5  ;;  %3259 = vmatprep.subr.mxu1 %v212_v5  ;;  %v130_v30 = vld [vmem:[%s4613_s0 + $0x370] sm:$0xff]  ;;  %v33_v31 = vld [vmem:[%s4613_s0 + $0x68] sm:$0xff]  ;;  %v131_v33 = vld [vmem:[%s4613_s0 + $0x378] sm:$0xff] }
   0xc   :  { %2957 = vmatmul.mubr.msk.f32.vlgmr.msra.gmra.mxu0 %vm224_vm1, %v21_v6  ;;  %3264 = vmatpush3.msra.mxu1 %v212_v5  ;;  %v34_v32 = vld [vmem:[%s4613_s0 + $0x70] sm:$0xff]  ;;  %v132_v34 = vld [vmem:[%s4613_s0 + $0x380] sm:$0xff]  ;;  %v35_v35 = vld [vmem:[%s4613_s0 + $0x78] sm:$0xff] }
   0xd   :  { %2959 = vmatprep.mubr.msk.f32.mxu0 %vm224_vm1, %v22_v7  ;;  %3103 = vmatprep.mubr.msk.f32.mxu1 %vm224_vm1, %v118_v8  ;;  %v36_v36 = vld [vmem:[%s4613_s0 + $0x80] sm:$0xff]  ;;  %v133_v37 = vld [vmem:[%s4613_s0 + $0x388] sm:$0xff]  ;;  %v134_v38 = vld [vmem:[%s4613_s0 + $0x390] sm:$0xff] }
   0xe   :  { %3104 = vmatmul.mubr.msk.f32.vlgmr.msra.gmra.mxu1 %vm224_vm1, %v119_v10  ;;  %v37_v39 = vld [vmem:[%s4613_s0 + $0x88] sm:$0xff]  ;;  %v38_v40 = vld [vmem:[%s4613_s0 + $0x90] sm:$0xff]  ;;  %v135_v41 = vld [vmem:[%s4613_s0 + $0x398] sm:$0xff] }
   0xf   :  { %3106 = vmatprep.mubr.msk.f32.mxu1 %vm224_vm1, %v120_v12  ;;  %v136_v42 = vld [vmem:[%s4613_s0 + $0x3a0] sm:$0xff]  ;;  %v39_v43 = vld [vmem:[%s4613_s0 + $0x98] sm:$0xff]  ;;  %v137_v45 = vld [vmem:[%s4613_s0 + $0x3a8] sm:$0xff] }
  0x10   :  { %2960 = vmatmul.mubr.msk.f32.gmra.mxu0 %vm224_vm1, %v23_v9  ;;  %v40_v44 = vld [vmem:[%s4613_s0 + $0xa0] sm:$0xff]  ;;  %v138_v46 = vld [vmem:[%s4613_s0 + $0x3b0] sm:$0xff]  ;;  %v41_v47 = vld [vmem:[%s4613_s0 + $0xa8] sm:$0xff] }
  0x11   :  { %2962 = vmatprep.mubr.msk.f32.mxu0 %vm224_vm1, %v24_v11  ;;  %v42_v48 = vld [vmem:[%s4613_s0 + $0xb0] sm:$0xff]  ;;  %v139_v49 = vld [vmem:[%s4613_s0 + $0x3b8] sm:$0xff]  ;;  %v140_v50 = vld [vmem:[%s4613_s0 + $0x3c0] sm:$0xff] }
  0x12   :  { %3107 = vmatmul.mubr.msk.f32.gmra.mxu1 %vm224_vm1, %v121_v13  ;;  %v43_v51 = vld [vmem:[%s4613_s0 + $0xb8] sm:$0xff]  ;;  %v44_v52 = vld [vmem:[%s4613_s0 + $0xc0] sm:$0xff]  ;;  %v141_v53 = vld [vmem:[%s4613_s0 + $0x3c8] sm:$0xff] }
  0x13   :  { %3109 = vmatprep.mubr.msk.f32.mxu1 %vm224_vm1, %v122_v14  ;;  %v142_v54 = vld [vmem:[%s4613_s0 + $0x3d0] sm:$0xff]  ;;  %v45_v55 = vld [vmem:[%s4613_s0 + $0xc8] sm:$0xff]  ;;  %v143_v57 = vld [vmem:[%s4613_s0 + $0x3d8] sm:$0xff] }
  0x14   :  { %2963 = vmatmul.mubr.msk.f32.gmra.mxu0 %vm224_vm1, %v25_v15  ;;  %v46_v56 = vld [vmem:[%s4613_s0 + $0xd0] sm:$0xff]  ;;  %v144_v58 = vld [vmem:[%s4613_s0 + $0x3e0] sm:$0xff]  ;;  %v47_v59 = vld [vmem:[%s4613_s0 + $0xd8] sm:$0xff] }
  0x15   :  { %2965 = vmatprep.mubr.msk.f32.mxu0 %vm224_vm1, %v26_v16  ;;  %v48_v60 = vld [vmem:[%s4613_s0 + $0xe0] sm:$0xff]  ;;  %v145_v61 = vld [vmem:[%s4613_s0 + $0x3e8] sm:$0xff]  ;;  %v146_v62 = vld [vmem:[%s4613_s0 + $0x3f0] sm:$0xff] }
  0x16   :  { %3110 = vmatmul.mubr.msk.f32.gmra.mxu1 %vm224_vm1, %v123_v17  ;;  %v49_v63 = vld [vmem:[%s4613_s0 + $0xe8] sm:$0xff]  ;;  %v50_v0 = vld [vmem:[%s4613_s0 + $0xf0] sm:$0xff]  ;;  %v147_v1 = vld [vmem:[%s4613_s0 + $0x3f8] sm:$0xff] }
  0x17   :  { %3112 = vmatprep.mubr.msk.f32.mxu1 %vm224_vm1, %v124_v18  ;;  %v148_v2 = vld [vmem:[%s4613_s0 + $0x400] sm:$0xff]  ;;  %v51_v3 = vld [vmem:[%s4613_s0 + $0xf8] sm:$0xff]  ;;  %v149_v5 = vld [vmem:[%s4613_s0 + $0x408] sm:$0xff] }
  0x18   :  { %2966 = vmatmul.mubr.msk.f32.gmra.mxu0 %vm224_vm1, %v27_v19  ;;  %v52_v4 = vld [vmem:[%s4613_s0 + $0x100] sm:$0xff]  ;;  %v150_v6 = vld [vmem:[%s4613_s0 + $0x410] sm:$0xff]  ;;  %v53_v7 = vld [vmem:[%s4613_s0 + $0x108] sm:$0xff] }
  0x19   :  { %2968 = vmatprep.mubr.msk.f32.mxu0 %vm224_vm1, %v28_v20  ;;  %v54_v8 = vld [vmem:[%s4613_s0 + $0x110] sm:$0xff]  ;;  %v151_v9 = vld [vmem:[%s4613_s0 + $0x418] sm:$0xff]  ;;  %v152_v10 = vld [vmem:[%s4613_s0 + $0x420] sm:$0xff] }
  0x1a   :  { %3113 = vmatmul.mubr.msk.f32.gmra.mxu1 %vm224_vm1, %v125_v21  ;;  %v55_v11 = vld [vmem:[%s4613_s0 + $0x118] sm:$0xff]  ;;  %v56_v12 = vld [vmem:[%s4613_s0 + $0x120] sm:$0xff]  ;;  %v153_v13 = vld [vmem:[%s4613_s0 + $0x428] sm:$0xff] }
  0x1b   :  { %3115 = vmatprep.mubr.msk.f32.mxu1 %vm224_vm1, %v126_v22  ;;  %v154_v14 = vld [vmem:[%s4613_s0 + $0x430] sm:$0xff]  ;;  %v57_v15 = vld [vmem:[%s4613_s0 + $0x128] sm:$0xff]  ;;  %v155_v17 = vld [vmem:[%s4613_s0 + $0x438] sm:$0xff] }
  0x1c   :  { %2969 = vmatmul.mubr.msk.f32.gmra.mxu0 %vm224_vm1, %v29_v23  ;;  %v58_v16 = vld [vmem:[%s4613_s0 + $0x130] sm:$0xff]  ;;  %v156_v18 = vld [vmem:[%s4613_s0 + $0x440] sm:$0xff]  ;;  %v59_v19 = vld [vmem:[%s4613_s0 + $0x138] sm:$0xff] }
  0x1d   :  { %2971 = vmatprep.mubr.msk.f32.mxu0 %vm224_vm1, %v30_v24  ;;  %v60_v20 = vld [vmem:[%s4613_s0 + $0x140] sm:$0xff]  ;;  %v157_v21 = vld [vmem:[%s4613_s0 + $0x448] sm:$0xff]  ;;  %v158_v22 = vld [vmem:[%s4613_s0 + $0x450] sm:$0xff] }
  0x1e   :  { %3116 = vmatmul.mubr.msk.f32.gmra.mxu1 %vm224_vm1, %v127_v25  ;;  %v61_v23 = vld [vmem:[%s4613_s0 + $0x148] sm:$0xff]  ;;  %v62_v24 = vld [vmem:[%s4613_s0 + $0x150] sm:$0xff]  ;;  %v159_v25 = vld [vmem:[%s4613_s0 + $0x458] sm:$0xff] }
  0x1f   :  { %3118 = vmatprep.mubr.msk.f32.mxu1 %vm224_vm1, %v128_v26  ;;  %v160_v26 = vld [vmem:[%s4613_s0 + $0x460] sm:$0xff] }
  0x20   :  { %2972 = vmatmul.mubr.msk.f32.gmra.mxu0 %vm224_vm1, %v31_v27  ;;  %v63_v27 = vld [vmem:[%s4613_s0 + $0x158] sm:$0xff] }
  0x21   :  { %2974 = vmatprep.mubr.msk.f32.mxu0 %vm224_vm1, %v32_v28  ;;  %v64_v28 = vld [vmem:[%s4613_s0 + $0x160] sm:$0xff] }
  0x22   :  { %3119 = vmatmul.mubr.msk.f32.gmra.mxu1 %vm224_vm1, %v129_v29  ;;  %v161_v29 = vld [vmem:[%s4613_s0 + $0x468] sm:$0xff] }
  0x23   :  { %3121 = vmatprep.mubr.msk.f32.mxu1 %vm224_vm1, %v130_v30  ;;  %v162_v30 = vld [vmem:[%s4613_s0 + $0x470] sm:$0xff] }
  0x24   :  { %2975 = vmatmul.mubr.msk.f32.gmra.mxu0 %vm224_vm1, %v33_v31  ;;  %v65_v31 = vld [vmem:[%s4613_s0 + $0x168] sm:$0xff] }
  0x25   :  { %2977 = vmatprep.mubr.msk.f32.mxu0 %vm224_vm1, %v34_v32  ;;  %v66_v32 = vld [vmem:[%s4613_s0 + $0x170] sm:$0xff] }
  0x26   :  { %3122 = vmatmul.mubr.msk.f32.gmra.mxu1 %vm224_vm1, %v131_v33  ;;  %v163_v33 = vld [vmem:[%s4613_s0 + $0x478] sm:$0xff] }
  0x27   :  { %3124 = vmatprep.mubr.msk.f32.mxu1 %vm224_vm1, %v132_v34  ;;  %v164_v34 = vld [vmem:[%s4613_s0 + $0x480] sm:$0xff] }
  0x28   :  { %2978 = vmatmul.mubr.msk.f32.gmra.mxu0 %vm224_vm1, %v35_v35  ;;  %v67_v35 = vld [vmem:[%s4613_s0 + $0x178] sm:$0xff] }
  0x29   :  { %2980 = vmatprep.mubr.msk.f32.mxu0 %vm224_vm1, %v36_v36  ;;  %v68_v36 = vld [vmem:[%s4613_s0 + $0x180] sm:$0xff] }
  0x2a   :  { %3125 = vmatmul.mubr.msk.f32.gmra.mxu1 %vm224_vm1, %v133_v37  ;;  %v165_v37 = vld [vmem:[%s4613_s0 + $0x488] sm:$0xff] }
  0x2b   :  { %3127 = vmatprep.mubr.msk.f32.mxu1 %vm224_vm1, %v134_v38  ;;  %v166_v38 = vld [vmem:[%s4613_s0 + $0x490] sm:$0xff] }
  0x2c   :  { %2981 = vmatmul.mubr.msk.f32.gmra.mxu0 %vm224_vm1, %v37_v39  ;;  %v69_v39 = vld [vmem:[%s4613_s0 + $0x188] sm:$0xff] }
  0x2d   :  { %2983 = vmatprep.mubr.msk.f32.mxu0 %vm224_vm1, %v38_v40  ;;  %v70_v40 = vld [vmem:[%s4613_s0 + $0x190] sm:$0xff] }
  0x2e   :  { %3128 = vmatmul.mubr.msk.f32.gmra.mxu1 %vm224_vm1, %v135_v41  ;;  %v167_v41 = vld [vmem:[%s4613_s0 + $0x498] sm:$0xff] }
  0x2f   :  { %3130 = vmatprep.mubr.msk.f32.mxu1 %vm224_vm1, %v136_v42  ;;  %v168_v42 = vld [vmem:[%s4613_s0 + $0x4a0] sm:$0xff] }
  0x30   :  { %2984 = vmatmul.mubr.msk.f32.gmra.mxu0 %vm224_vm1, %v39_v43  ;;  %v71_v43 = vld [vmem:[%s4613_s0 + $0x198] sm:$0xff] }
  0x31   :  { %2986 = vmatprep.mubr.msk.f32.mxu0 %vm224_vm1, %v40_v44  ;;  %v72_v44 = vld [vmem:[%s4613_s0 + $0x1a0] sm:$0xff] }
  0x32   :  { %3131 = vmatmul.mubr.msk.f32.gmra.mxu1 %vm224_vm1, %v137_v45  ;;  %v169_v45 = vld [vmem:[%s4613_s0 + $0x4a8] sm:$0xff] }
  0x33   :  { %3133 = vmatprep.mubr.msk.f32.mxu1 %vm224_vm1, %v138_v46  ;;  %v170_v46 = vld [vmem:[%s4613_s0 + $0x4b0] sm:$0xff] }
  0x34   :  { %2987 = vmatmul.mubr.msk.f32.gmra.mxu0 %vm224_vm1, %v41_v47  ;;  %v73_v47 = vld [vmem:[%s4613_s0 + $0x1a8] sm:$0xff] }
  0x35   :  { %2989 = vmatprep.mubr.msk.f32.mxu0 %vm224_vm1, %v42_v48  ;;  %v74_v48 = vld [vmem:[%s4613_s0 + $0x1b0] sm:$0xff] }
  0x36   :  { %3134 = vmatmul.mubr.msk.f32.gmra.mxu1 %vm224_vm1, %v139_v49  ;;  %v171_v49 = vld [vmem:[%s4613_s0 + $0x4b8] sm:$0xff] }
  0x37   :  { %3136 = vmatprep.mubr.msk.f32.mxu1 %vm224_vm1, %v140_v50  ;;  %v172_v50 = vld [vmem:[%s4613_s0 + $0x4c0] sm:$0xff] }
  0x38   :  { %2990 = vmatmul.mubr.msk.f32.gmra.mxu0 %vm224_vm1, %v43_v51  ;;  %v75_v51 = vld [vmem:[%s4613_s0 + $0x1b8] sm:$0xff] }
  0x39   :  { %2992 = vmatprep.mubr.msk.f32.mxu0 %vm224_vm1, %v44_v52  ;;  %v76_v52 = vld [vmem:[%s4613_s0 + $0x1c0] sm:$0xff] }
  0x3a   :  { %3137 = vmatmul.mubr.msk.f32.gmra.mxu1 %vm224_vm1, %v141_v53  ;;  %v173_v53 = vld [vmem:[%s4613_s0 + $0x4c8] sm:$0xff] }
  0x3b   :  { %3139 = vmatprep.mubr.msk.f32.mxu1 %vm224_vm1, %v142_v54  ;;  %v174_v54 = vld [vmem:[%s4613_s0 + $0x4d0] sm:$0xff] }
  0x3c   :  { %2993 = vmatmul.mubr.msk.f32.gmra.mxu0 %vm224_vm1, %v45_v55  ;;  %v77_v55 = vld [vmem:[%s4613_s0 + $0x1c8] sm:$0xff] }
  0x3d   :  { %2995 = vmatprep.mubr.msk.f32.mxu0 %vm224_vm1, %v46_v56  ;;  %v78_v56 = vld [vmem:[%s4613_s0 + $0x1d0] sm:$0xff] }
  0x3e   :  { %3140 = vmatmul.mubr.msk.f32.gmra.mxu1 %vm224_vm1, %v143_v57  ;;  %v175_v57 = vld [vmem:[%s4613_s0 + $0x4d8] sm:$0xff] }
  0x3f   :  { %3142 = vmatprep.mubr.msk.f32.mxu1 %vm224_vm1, %v144_v58  ;;  %v176_v58 = vld [vmem:[%s4613_s0 + $0x4e0] sm:$0xff] }
  0x40   :  { %2996 = vmatmul.mubr.msk.f32.gmra.mxu0 %vm224_vm1, %v47_v59  ;;  %v79_v59 = vld [vmem:[%s4613_s0 + $0x1d8] sm:$0xff] }
  0x41   :  { %2998 = vmatprep.mubr.msk.f32.mxu0 %vm224_vm1, %v48_v60  ;;  %v80_v60 = vld [vmem:[%s4613_s0 + $0x1e0] sm:$0xff] }
  0x42   :  { %3143 = vmatmul.mubr.msk.f32.gmra.mxu1 %vm224_vm1, %v145_v61  ;;  %v177_v61 = vld [vmem:[%s4613_s0 + $0x4e8] sm:$0xff] }
  0x43   :  { %3145 = vmatprep.mubr.msk.f32.mxu1 %vm224_vm1, %v146_v62  ;;  %v178_v62 = vld [vmem:[%s4613_s0 + $0x4f0] sm:$0xff] }
  0x44   :  { %2999 = vmatmul.mubr.msk.f32.gmra.mxu0 %vm224_vm1, %v49_v63  ;;  %v81_v63 = vld [vmem:[%s4613_s0 + $0x1e8] sm:$0xff] }
  0x45   :  { %3001 = vmatprep.mubr.msk.f32.mxu0 %vm224_vm1, %v50_v0  ;;  %v82_v0 = vld [vmem:[%s4613_s0 + $0x1f0] sm:$0xff] }
  0x46   :  { %3146 = vmatmul.mubr.msk.f32.gmra.mxu1 %vm224_vm1, %v147_v1  ;;  %v179_v1 = vld [vmem:[%s4613_s0 + $0x4f8] sm:$0xff] }
  0x47   :  { %3148 = vmatprep.mubr.msk.f32.mxu1 %vm224_vm1, %v148_v2  ;;  %v180_v2 = vld [vmem:[%s4613_s0 + $0x500] sm:$0xff] }
  0x48   :  { %3002 = vmatmul.mubr.msk.f32.gmra.mxu0 %vm224_vm1, %v51_v3  ;;  %v83_v3 = vld [vmem:[%s4613_s0 + $0x1f8] sm:$0xff] }
  0x49   :  { %3004 = vmatprep.mubr.msk.f32.mxu0 %vm224_vm1, %v52_v4  ;;  %v84_v4 = vld [vmem:[%s4613_s0 + $0x200] sm:$0xff] }
  0x4a   :  { %3149 = vmatmul.mubr.msk.f32.gmra.mxu1 %vm224_vm1, %v149_v5  ;;  %v181_v5 = vld [vmem:[%s4613_s0 + $0x508] sm:$0xff] }
  0x4b   :  { %3151 = vmatprep.mubr.msk.f32.mxu1 %vm224_vm1, %v150_v6  ;;  %v182_v6 = vld [vmem:[%s4613_s0 + $0x510] sm:$0xff] }
  0x4c   :  { %3005 = vmatmul.mubr.msk.f32.gmra.mxu0 %vm224_vm1, %v53_v7  ;;  %v85_v7 = vld [vmem:[%s4613_s0 + $0x208] sm:$0xff] }
  0x4d   :  { %3007 = vmatprep.mubr.msk.f32.mxu0 %vm224_vm1, %v54_v8  ;;  %v86_v8 = vld [vmem:[%s4613_s0 + $0x210] sm:$0xff] }
  0x4e   :  { %3152 = vmatmul.mubr.msk.f32.gmra.mxu1 %vm224_vm1, %v151_v9  ;;  %v183_v9 = vld [vmem:[%s4613_s0 + $0x518] sm:$0xff] }
  0x4f   :  { %3154 = vmatprep.mubr.msk.f32.mxu1 %vm224_vm1, %v152_v10  ;;  %v184_v10 = vld [vmem:[%s4613_s0 + $0x520] sm:$0xff] }
  0x50   :  { %3008 = vmatmul.mubr.msk.f32.gmra.mxu0 %vm224_vm1, %v55_v11  ;;  %v87_v11 = vld [vmem:[%s4613_s0 + $0x218] sm:$0xff] }
  0x51   :  { %3010 = vmatprep.mubr.msk.f32.mxu0 %vm224_vm1, %v56_v12  ;;  %v88_v12 = vld [vmem:[%s4613_s0 + $0x220] sm:$0xff] }
  0x52   :  { %3155 = vmatmul.mubr.msk.f32.gmra.mxu1 %vm224_vm1, %v153_v13  ;;  %v185_v13 = vld [vmem:[%s4613_s0 + $0x528] sm:$0xff] }
  0x53   :  { %3157 = vmatprep.mubr.msk.f32.mxu1 %vm224_vm1, %v154_v14  ;;  %v186_v14 = vld [vmem:[%s4613_s0 + $0x530] sm:$0xff] }
  0x54   :  { %3011 = vmatmul.mubr.msk.f32.gmra.mxu0 %vm224_vm1, %v57_v15  ;;  %v89_v15 = vld [vmem:[%s4613_s0 + $0x228] sm:$0xff] }
  0x55   :  { %3013 = vmatprep.mubr.msk.f32.mxu0 %vm224_vm1, %v58_v16  ;;  %v90_v16 = vld [vmem:[%s4613_s0 + $0x230] sm:$0xff] }
  0x56   :  { %3158 = vmatmul.mubr.msk.f32.gmra.mxu1 %vm224_vm1, %v155_v17  ;;  %v187_v17 = vld [vmem:[%s4613_s0 + $0x538] sm:$0xff] }
  0x57   :  { %3160 = vmatprep.mubr.msk.f32.mxu1 %vm224_vm1, %v156_v18  ;;  %v188_v18 = vld [vmem:[%s4613_s0 + $0x540] sm:$0xff] }
  0x58   :  { %3014 = vmatmul.mubr.msk.f32.gmra.mxu0 %vm224_vm1, %v59_v19  ;;  %v91_v19 = vld [vmem:[%s4613_s0 + $0x238] sm:$0xff] }
  0x59   :  { %3016 = vmatprep.mubr.msk.f32.mxu0 %vm224_vm1, %v60_v20  ;;  %v92_v20 = vld [vmem:[%s4613_s0 + $0x240] sm:$0xff] }
  0x5a   :  { %3161 = vmatmul.mubr.msk.f32.gmra.mxu1 %vm224_vm1, %v157_v21  ;;  %v189_v21 = vld [vmem:[%s4613_s0 + $0x548] sm:$0xff] }
  0x5b   :  { %3163 = vmatprep.mubr.msk.f32.mxu1 %vm224_vm1, %v158_v22  ;;  %v190_v22 = vld [vmem:[%s4613_s0 + $0x550] sm:$0xff] }
  0x5c   :  { %3017 = vmatmul.mubr.msk.f32.gmra.mxu0 %vm224_vm1, %v61_v23  ;;  %v93_v23 = vld [vmem:[%s4613_s0 + $0x248] sm:$0xff] }
  0x5d   :  { %3019 = vmatprep.mubr.msk.f32.mxu0 %vm224_vm1, %v62_v24  ;;  %v94_v24 = vld [vmem:[%s4613_s0 + $0x250] sm:$0xff] }
  0x5e   :  { %3164 = vmatmul.mubr.msk.f32.gmra.mxu1 %vm224_vm1, %v159_v25  ;;  %v191_v25 = vld [vmem:[%s4613_s0 + $0x558] sm:$0xff] }
  0x5f   :  { %3166 = vmatprep.mubr.msk.f32.mxu1 %vm224_vm1, %v160_v26  ;;  %v192_v26 = vld [vmem:[%s4613_s0 + $0x560] sm:$0xff] }
  0x60   :  { %3020 = vmatmul.mubr.msk.f32.gmra.mxu0 %vm224_vm1, %v63_v27  ;;  %v95_v27 = vld [vmem:[%s4613_s0 + $0x258] sm:$0xff] }
  0x61   :  { %3022 = vmatprep.mubr.msk.f32.mxu0 %vm224_vm1, %v64_v28  ;;  %v96_v28 = vld [vmem:[%s4613_s0 + $0x260] sm:$0xff] }
  0x62   :  { %3167 = vmatmul.mubr.msk.f32.gmra.mxu1 %vm224_vm1, %v161_v29  ;;  %v193_v29 = vld [vmem:[%s4613_s0 + $0x568] sm:$0xff] }
  0x63   :  { %3169 = vmatprep.mubr.msk.f32.mxu1 %vm224_vm1, %v162_v30  ;;  %v194_v30 = vld [vmem:[%s4613_s0 + $0x570] sm:$0xff] }
  0x64   :  { %3023 = vmatmul.mubr.msk.f32.gmra.mxu0 %vm224_vm1, %v65_v31  ;;  %v97_v31 = vld [vmem:[%s4613_s0 + $0x268] sm:$0xff] }
  0x65   :  { %3025 = vmatprep.mubr.msk.f32.mxu0 %vm224_vm1, %v66_v32  ;;  %v98_v32 = vld [vmem:[%s4613_s0 + $0x270] sm:$0xff] }
  0x66   :  { %3170 = vmatmul.mubr.msk.f32.gmra.mxu1 %vm224_vm1, %v163_v33  ;;  %v195_v33 = vld [vmem:[%s4613_s0 + $0x578] sm:$0xff] }
  0x67   :  { %3172 = vmatprep.mubr.msk.f32.mxu1 %vm224_vm1, %v164_v34  ;;  %v196_v34 = vld [vmem:[%s4613_s0 + $0x580] sm:$0xff] }
  0x68   :  { %3026 = vmatmul.mubr.msk.f32.gmra.mxu0 %vm224_vm1, %v67_v35  ;;  %v99_v35 = vld [vmem:[%s4613_s0 + $0x278] sm:$0xff] }
  0x69   :  { %3028 = vmatprep.mubr.msk.f32.mxu0 %vm224_vm1, %v68_v36  ;;  %v100_v36 = vld [vmem:[%s4613_s0 + $0x280] sm:$0xff] }
  0x6a   :  { %3173 = vmatmul.mubr.msk.f32.gmra.mxu1 %vm224_vm1, %v165_v37  ;;  %v197_v37 = vld [vmem:[%s4613_s0 + $0x588] sm:$0xff] }
  0x6b   :  { %3175 = vmatprep.mubr.msk.f32.mxu1 %vm224_vm1, %v166_v38  ;;  %v198_v38 = vld [vmem:[%s4613_s0 + $0x590] sm:$0xff] }
  0x6c   :  { %3029 = vmatmul.mubr.msk.f32.gmra.mxu0 %vm224_vm1, %v69_v39  ;;  %v101_v39 = vld [vmem:[%s4613_s0 + $0x288] sm:$0xff] }
  0x6d   :  { %3031 = vmatprep.mubr.msk.f32.mxu0 %vm224_vm1, %v70_v40  ;;  %v102_v40 = vld [vmem:[%s4613_s0 + $0x290] sm:$0xff] }
  0x6e   :  { %3176 = vmatmul.mubr.msk.f32.gmra.mxu1 %vm224_vm1, %v167_v41  ;;  %v199_v41 = vld [vmem:[%s4613_s0 + $0x598] sm:$0xff] }
  0x6f   :  { %3178 = vmatprep.mubr.msk.f32.mxu1 %vm224_vm1, %v168_v42  ;;  %v200_v42 = vld [vmem:[%s4613_s0 + $0x5a0] sm:$0xff] }
  0x70   :  { %3032 = vmatmul.mubr.msk.f32.gmra.mxu0 %vm224_vm1, %v71_v43  ;;  %v103_v43 = vld [vmem:[%s4613_s0 + $0x298] sm:$0xff] }
  0x71   :  { %3034 = vmatprep.mubr.msk.f32.mxu0 %vm224_vm1, %v72_v44  ;;  %v4618_v44 = vmov 0.0  }
  0x72   :  { %3179 = vmatmul.mubr.msk.f32.gmra.mxu1 %vm224_vm1, %v169_v45  ;;  %3244 = vmatprep.subr.mxu1 %v4618_v44  ;;  %v2447_v45 = vld [vmem:[%s4614_s3 + $0x18] sm:$0xff] }
  0x73   :  { %3181 = vmatprep.mubr.msk.f32.mxu1 %vm224_vm1, %v170_v46  ;;  %v104_v46 = vld [vmem:[%s4613_s0 + $0x2a0] sm:$0xff]  ;;  %3245 = vmatpush3.msra.mxu1 %v2447_v45 }
  0x74   :  { %3035 = vmatmul.mubr.msk.f32.gmra.mxu0 %vm224_vm1, %v73_v47  ;;  %v201_v47 = vld [vmem:[%s4613_s0 + $0x5a8] sm:$0xff]  ;;  %3246 = vmatprep.subr.mxu1 %v4618_v44 }
  0x75   :  { %3037 = vmatprep.mubr.msk.f32.mxu0 %vm224_vm1, %v74_v48  ;;  %v202_v48 = vld [vmem:[%s4613_s0 + $0x5b0] sm:$0xff] }
  0x76   :  { %3182 = vmatmul.mubr.msk.f32.gmra.mxu1 %vm224_vm1, %v171_v49  ;;  %v105_v49 = vld [vmem:[%s4613_s0 + $0x2a8] sm:$0xff] }
  0x77   :  { %3184 = vmatprep.mubr.msk.f32.mxu1 %vm224_vm1, %v172_v50  ;;  %v106_v50 = vld [vmem:[%s4613_s0 + $0x2b0] sm:$0xff] }
  0x78   :  { %3038 = vmatmul.mubr.msk.f32.gmra.mxu0 %vm224_vm1, %v75_v51  ;;  %v203_v51 = vld [vmem:[%s4613_s0 + $0x5b8] sm:$0xff] }
  0x79   :  { %3040 = vmatprep.mubr.msk.f32.mxu0 %vm224_vm1, %v76_v52  ;;  %v204_v52 = vld [vmem:[%s4613_s0 + $0x5c0] sm:$0xff] }
  0x7a   :  { %3185 = vmatmul.mubr.msk.f32.gmra.mxu1 %vm224_vm1, %v173_v53  ;;  %v107_v53 = vld [vmem:[%s4613_s0 + $0x2b8] sm:$0xff] }
  0x7b   :  { %3187 = vmatprep.mubr.msk.f32.mxu1 %vm224_vm1, %v174_v54  ;;  %v108_v54 = vld [vmem:[%s4613_s0 + $0x2c0] sm:$0xff] }
  0x7c   :  { %3041 = vmatmul.mubr.msk.f32.gmra.mxu0 %vm224_vm1, %v77_v55  ;;  %v205_v55 = vld [vmem:[%s4613_s0 + $0x5c8] sm:$0xff] }
  0x7d   :  { %3043 = vmatprep.mubr.msk.f32.mxu0 %vm224_vm1, %v78_v56  ;;  %v206_v56 = vld [vmem:[%s4613_s0 + $0x5d0] sm:$0xff] }
  0x7e   :  { %3188 = vmatmul.mubr.msk.f32.gmra.mxu1 %vm224_vm1, %v175_v57  ;;  %v109_v57 = vld [vmem:[%s4613_s0 + $0x2c8] sm:$0xff] }
  0x7f   :  { %3190 = vmatprep.mubr.msk.f32.mxu1 %vm224_vm1, %v176_v58  ;;  %v110_v58 = vld [vmem:[%s4613_s0 + $0x2d0] sm:$0xff] }
  0x80   :  { %3044 = vmatmul.mubr.msk.f32.gmra.mxu0 %vm224_vm1, %v79_v59  ;;  %v207_v59 = vld [vmem:[%s4613_s0 + $0x5d8] sm:$0xff] }
  0x81   :  { %3046 = vmatprep.mubr.msk.f32.mxu0 %vm224_vm1, %v80_v60  ;;  %v208_v60 = vld [vmem:[%s4613_s0 + $0x5e0] sm:$0xff] }
  0x82   :  { %3191 = vmatmul.mubr.msk.f32.gmra.mxu1 %vm224_vm1, %v177_v61  ;;  %v111_v61 = vld [vmem:[%s4613_s0 + $0x2d8] sm:$0xff] }
  0x83   :  { %3193 = vmatprep.mubr.msk.f32.mxu1 %vm224_vm1, %v178_v62  ;;  %v112_v62 = vld [vmem:[%s4613_s0 + $0x2e0] sm:$0xff] }
  0x84   :  { %3047 = vmatmul.mubr.msk.f32.gmra.mxu0 %vm224_vm1, %v81_v63  ;;  %v209_v63 = vld [vmem:[%s4613_s0 + $0x5e8] sm:$0xff] }
  0x85   :  { %3049 = vmatprep.mubr.msk.f32.mxu0 %vm224_vm1, %v82_v0  ;;  %v210_v0 = vld [vmem:[%s4613_s0 + $0x5f0] sm:$0xff] }
  0x86   :  { %3194 = vmatmul.mubr.msk.f32.gmra.mxu1 %vm224_vm1, %v179_v1  ;;  %v113_v1 = vld [vmem:[%s4613_s0 + $0x2e8] sm:$0xff] }
  0x87   :  { %3196 = vmatprep.mubr.msk.f32.mxu1 %vm224_vm1, %v180_v2  ;;  %v114_v2 = vld [vmem:[%s4613_s0 + $0x2f0] sm:$0xff] }
  0x88   :  { %3050 = vmatmul.mubr.msk.f32.gmra.mxu0 %vm224_vm1, %v83_v3  ;;  %v211_v3 = vld [vmem:[%s4613_s0 + $0x5f8] sm:$0xff] }
  0x89   :  { %3052 = vmatprep.mubr.msk.f32.mxu0 %vm224_vm1, %v84_v4  ;;  %v115_v4 = vld [vmem:[%s4613_s0 + $0x2f8] sm:$0xff] }
  0x8a   :  { %3197 = vmatmul.mubr.msk.f32.gmra.mxu1 %vm224_vm1, %v181_v5  ;;  %v116_v5 = vld [vmem:[%s4613_s0 + $0x300] sm:$0xff] }
  0x8b   :  { %3199 = vmatprep.mubr.msk.f32.mxu1 %vm224_vm1, %v182_v6  ;;  %v117_v6 = vld [vmem:[%s4613_s0 + $0x308] sm:$0xff] }
  0x8c   :  { %3053 = vmatmul.mubr.msk.f32.gmra.mxu0 %vm224_vm1, %v85_v7  ;;  %v4090_v7 = vld [vmem:[%s4615_s2] ss:$0 sm:$0xff] }
  0x8d   :  { %3055 = vmatprep.mubr.msk.f32.mxu0 %vm224_vm1, %v86_v8 }
  0x8e   :  { %3200 = vmatmul.mubr.msk.f32.gmra.mxu1 %vm224_vm1, %v183_v9 }
  0x8f   :  { %3202 = vmatprep.mubr.msk.f32.mxu1 %vm224_vm1, %v184_v10 }
  0x90   :  { %3056 = vmatmul.mubr.msk.f32.gmra.mxu0 %vm224_vm1, %v87_v11 }
  0x91   :  { %3058 = vmatprep.mubr.msk.f32.mxu0 %vm224_vm1, %v88_v12 }
  0x92   :  { %3203 = vmatmul.mubr.msk.f32.gmra.mxu1 %vm224_vm1, %v185_v13 }
  0x93   :  { %3205 = vmatprep.mubr.msk.f32.mxu1 %vm224_vm1, %v186_v14 }
  0x94   :  { %3059 = vmatmul.mubr.msk.f32.gmra.mxu0 %vm224_vm1, %v89_v15 }
  0x95   :  { %3061 = vmatprep.mubr.msk.f32.mxu0 %vm224_vm1, %v90_v16 }
  0x96   :  { %3206 = vmatmul.mubr.msk.f32.gmra.mxu1 %vm224_vm1, %v187_v17 }
  0x97   :  { %3208 = vmatprep.mubr.msk.f32.mxu1 %vm224_vm1, %v188_v18 }
  0x98   :  { %3062 = vmatmul.mubr.msk.f32.gmra.mxu0 %vm224_vm1, %v91_v19 }
  0x99   :  { %3064 = vmatprep.mubr.msk.f32.mxu0 %vm224_vm1, %v92_v20 }
  0x9a   :  { %3209 = vmatmul.mubr.msk.f32.gmra.mxu1 %vm224_vm1, %v189_v21 }
  0x9b   :  { %3211 = vmatprep.mubr.msk.f32.mxu1 %vm224_vm1, %v190_v22 }
  0x9c   :  { %3065 = vmatmul.mubr.msk.f32.gmra.mxu0 %vm224_vm1, %v93_v23 }
  0x9d   :  { %3067 = vmatprep.mubr.msk.f32.mxu0 %vm224_vm1, %v94_v24 }
  0x9e   :  { %3212 = vmatmul.mubr.msk.f32.gmra.mxu1 %vm224_vm1, %v191_v25 }
  0x9f   :  { %3214 = vmatprep.mubr.msk.f32.mxu1 %vm224_vm1, %v192_v26 }
  0xa0   :  { %3068 = vmatmul.mubr.msk.f32.gmra.mxu0 %vm224_vm1, %v95_v27 }
  0xa1   :  { %3070 = vmatprep.mubr.msk.f32.mxu0 %vm224_vm1, %v96_v28 }
  0xa2   :  { %3215 = vmatmul.mubr.msk.f32.gmra.mxu1 %vm224_vm1, %v193_v29 }
  0xa3   :  { %3217 = vmatprep.mubr.msk.f32.mxu1 %vm224_vm1, %v194_v30 }
  0xa4   :  { %3071 = vmatmul.mubr.msk.f32.gmra.mxu0 %vm224_vm1, %v97_v31 }
  0xa5   :  { %3073 = vmatprep.mubr.msk.f32.mxu0 %vm224_vm1, %v98_v32 }
  0xa6   :  { %3218 = vmatmul.mubr.msk.f32.gmra.mxu1 %vm224_vm1, %v195_v33 }
  0xa7   :  { %3220 = vmatprep.mubr.msk.f32.mxu1 %vm224_vm1, %v196_v34 }
  0xa8   :  { %3074 = vmatmul.mubr.msk.f32.gmra.mxu0 %vm224_vm1, %v99_v35 }
  0xa9   :  { %3076 = vmatprep.mubr.msk.f32.mxu0 %vm224_vm1, %v100_v36 }
  0xaa   :  { %3221 = vmatmul.mubr.msk.f32.gmra.mxu1 %vm224_vm1, %v197_v37 }
  0xab   :  { %3223 = vmatprep.mubr.msk.f32.mxu1 %vm224_vm1, %v198_v38 }
  0xac   :  { %3077 = vmatmul.mubr.msk.f32.gmra.mxu0 %vm224_vm1, %v101_v39 }
  0xad   :  { %3079 = vmatprep.mubr.msk.f32.mxu0 %vm224_vm1, %v102_v40 }
  0xae   :  { %3224 = vmatmul.mubr.msk.f32.gmra.mxu1 %vm224_vm1, %v199_v41 }
  0xaf   :  { %3226 = vmatprep.mubr.msk.f32.mxu1 %vm224_vm1, %v200_v42 }
  0xb0   :  { %3080 = vmatmul.mubr.msk.f32.gmra.mxu0 %vm224_vm1, %v103_v43 }
  0xb1   :  { %3082 = vmatprep.mubr.msk.f32.mxu0 %vm224_vm1, %v104_v46 }
  0xb2   :  { %3227 = vmatmul.mubr.msk.f32.gmra.mxu1 %vm224_vm1, %v201_v47 }
  0xb3   :  { %3229 = vmatprep.mubr.msk.f32.mxu1 %vm224_vm1, %v202_v48 }
  0xb4   :  { %3083 = vmatmul.mubr.msk.f32.gmra.mxu0 %vm224_vm1, %v105_v49 }
  0xb5   :  { %3085 = vmatprep.mubr.msk.f32.mxu0 %vm224_vm1, %v106_v50 }
  0xb6   :  { %3230 = vmatmul.mubr.msk.f32.gmra.mxu1 %vm224_vm1, %v203_v51 }
  0xb7   :  { %3232 = vmatprep.mubr.msk.f32.mxu1 %vm224_vm1, %v204_v52 }
  0xb8   :  { %3086 = vmatmul.mubr.msk.f32.gmra.mxu0 %vm224_vm1, %v107_v53 }
  0xb9   :  { %3088 = vmatprep.mubr.msk.f32.mxu0 %vm224_vm1, %v108_v54 }
  0xba   :  { %3233 = vmatmul.mubr.msk.f32.gmra.mxu1 %vm224_vm1, %v205_v55 }
  0xbb   :  { %3235 = vmatprep.mubr.msk.f32.mxu1 %vm224_vm1, %v206_v56 }
  0xbc   :  { %3089 = vmatmul.mubr.msk.f32.gmra.mxu0 %vm224_vm1, %v109_v57 }
  0xbd   :  { %3091 = vmatprep.mubr.msk.f32.mxu0 %vm224_vm1, %v110_v58 }
  0xbe   :  { %3236 = vmatmul.mubr.msk.f32.gmra.mxu1 %vm224_vm1, %v207_v59 }
  0xbf   :  { %3238 = vmatprep.mubr.msk.f32.mxu1 %vm224_vm1, %v208_v60 }
  0xc0   :  { %3092 = vmatmul.mubr.msk.f32.gmra.mxu0 %vm224_vm1, %v111_v61 }
  0xc1   :  { %3094 = vmatprep.mubr.msk.f32.mxu0 %vm224_vm1, %v112_v62 }
  0xc2   :  { %3239 = vmatmul.mubr.msk.f32.gmra.mxu1 %vm224_vm1, %v209_v63 }
  0xc3   :  { %3241 = vmatprep.mubr.msk.f32.mxu1 %vm224_vm1, %v210_v0 }
  0xc4   :  { %3095 = vmatmul.mubr.msk.f32.gmra.mxu0 %vm224_vm1, %v113_v1 }
  0xc5   :  { %3097 = vmatprep.mubr.msk.f32.mxu0 %vm224_vm1, %v114_v2 }
  0xc6   :  { %3242 = vmatmul.mubr.msk.f32.gmra.mxu1 %vm224_vm1, %v211_v3 }
  0xc8   :  { %3098 = vmatmul.mubr.msk.f32.gmra.mxu0 %vm224_vm1, %v115_v4  ;;  %v2446_v4 = vld [vmem:[%s4614_s3 + $0x10] sm:$0xff] }
  0xc9   :  { %3100 = vmatprep.mubr.msk.f32.mxu0 %vm224_vm1, %v116_v5  ;;  %3247 = vmatpush3.msra.mxu1 %v2446_v4 }
  0xca   :  { %3248 = vmatprep.subr.mxu1 %v4618_v44 }
  0xcc   :  { %v2958_v8 = vpop.f32.mrf.mxu0  ;;  %3101 = vmatmul.mubr.msk.f32.gmra.mxu0 %vm224_vm1, %v117_v6 }
  0xcd   :  { %v877_v9 = vadd.f32 %v2958_v8, %v4090_v7 }
  0xce   :  { %v871_v10 = vpop.f32.mrf.mxu0  ;;  %v4094_v11 = vpop.f32.mrf.mxu1 }
  0xcf   :  { %v1831_v12 = vmax.f32 %v877_v9, 0.0  ;;  %v872_v13 = vadd.f32 %v4090_v7, %v871_v10 }
  0xd0   :  { %v2961_v14 = vpop.f32.mrf.mxu0  ;;  %v4097_v15 = vpop.f32.mrf.mxu1 }
  0xd1   :  { %v1830_v16 = vmax.f32 %v872_v13, 0.0  ;;  %v887_v17 = vadd.f32 %v2961_v14, %v4090_v7  ;;  %v2024_v20 = vsel %vm2022_vm2, %v1831_v12, 0.0 }
  0xd2   :  { %v881_v18 = vpop.f32.mrf.mxu0  ;;  %v4100_v19 = vpop.f32.mrf.mxu1 }
  0xd3   :  { %v2023_v21 = vsel %vm2022_vm2, %v1830_v16, 0.0  ;;  %v882_v22 = vadd.f32 %v4090_v7, %v881_v18  ;;  %v1833_v26 = vmax.f32 %v887_v17, 0.0 }
  0xd4   :  { %v2025_v23 = vadd.f32 %v2024_v20, %v2023_v21  ;;  %v2964_v24 = vpop.f32.mrf.mxu0  ;;  %v4105_v25 = vpop.f32.mrf.mxu1 }
  0xd5   :  { %v1832_v27 = vmax.f32 %v882_v22, 0.0  ;;  %v897_v28 = vadd.f32 %v2964_v24, %v4090_v7  ;;  %v2028_v36 = vsel %vm2022_vm2, %v1833_v26, 0.0 }
  0xd6   :  { %v891_v29 = vpop.f32.mrf.mxu0  ;;  %v4108_v30 = vpop.f32.mrf.mxu1 }
  0xd7   :  { %v2026_v31 = vsel %vm2022_vm2, %v1832_v27, 0.0  ;;  %v892_v32 = vadd.f32 %v4090_v7, %v891_v29  ;;  %v1835_v37 = vmax.f32 %v897_v28, 0.0 }
  0xd8   :  { %v2027_v33 = vadd.f32 %v2026_v31, %v2025_v23  ;;  %v2967_v34 = vpop.f32.mrf.mxu0  ;;  %v4112_v35 = vpop.f32.mrf.mxu1 }
  0xd9   :  { %v1834_v38 = vmax.f32 %v892_v32, 0.0  ;;  %v907_v39 = vadd.f32 %v2967_v34, %v4090_v7  ;;  %v2032_v49 = vsel %vm2022_vm2, %v1835_v37, 0.0 }
  0xda   :  { %v2029_v40 = vadd.f32 %v2028_v36, %v2027_v33  ;;  %v901_v41 = vpop.f32.mrf.mxu0  ;;  %v4116_v42 = vpop.f32.mrf.mxu1 }
  0xdb   :  { %v2030_v43 = vsel %vm2022_vm2, %v1834_v38, 0.0  ;;  %v902_v45 = vadd.f32 %v4090_v7, %v901_v41  ;;  %v1837_v50 = vmax.f32 %v907_v39, 0.0 }
  0xdc   :  { %v2031_v46 = vadd.f32 %v2030_v43, %v2029_v40  ;;  %v2970_v47 = vpop.f32.mrf.mxu0  ;;  %v4120_v48 = vpop.f32.mrf.mxu1 }
  0xdd   :  { %v1836_v51 = vmax.f32 %v902_v45, 0.0  ;;  %v917_v52 = vadd.f32 %v2970_v47, %v4090_v7  ;;  %v2036_v61 = vsel %vm2022_vm2, %v1837_v50, 0.0 }
  0xde   :  { %v2033_v53 = vadd.f32 %v2032_v49, %v2031_v46  ;;  %v911_v54 = vpop.f32.mrf.mxu0  ;;  %v4124_v55 = vpop.f32.mrf.mxu1 }
  0xdf   :  { %v2034_v56 = vsel %vm2022_vm2, %v1836_v51, 0.0  ;;  %v912_v57 = vadd.f32 %v4090_v7, %v911_v54  ;;  %v1839_v62 = vmax.f32 %v917_v52, 0.0 }
  0xe0   :  { %v2035_v58 = vadd.f32 %v2034_v56, %v2033_v53  ;;  %v2973_v59 = vpop.f32.mrf.mxu0  ;;  %v4128_v60 = vpop.f32.mrf.mxu1 }
  0xe1   :  { %v1838_v63 = vmax.f32 %v912_v57, 0.0  ;;  %v927_v0 = vadd.f32 %v2973_v59, %v4090_v7  ;;  %v2040_v12 = vsel %vm2022_vm2, %v1839_v62, 0.0 }
  0xe2   :  { %v2037_v1 = vadd.f32 %v2036_v61, %v2035_v58  ;;  %v921_v2 = vpop.f32.mrf.mxu0  ;;  %v4132_v3 = vpop.f32.mrf.mxu1 }
  0xe3   :  { %v2038_v5 = vsel %vm2022_vm2, %v1838_v63, 0.0  ;;  %v922_v6 = vadd.f32 %v4090_v7, %v921_v2  ;;  %v1841_v13 = vmax.f32 %v927_v0, 0.0 }
  0xe4   :  { %v2039_v8 = vadd.f32 %v2038_v5, %v2037_v1  ;;  %v2976_v9 = vpop.f32.mrf.mxu0  ;;  %v4139_v10 = vpop.f32.mrf.mxu1 }
  0xe5   :  { %v1840_v14 = vmax.f32 %v922_v6, 0.0  ;;  %v937_v16 = vadd.f32 %v2976_v9, %v4090_v7  ;;  %v2044_v27 = vsel %vm2022_vm2, %v1841_v13, 0.0 }
  0xe6   :  { %v2041_v17 = vadd.f32 %v2040_v12, %v2039_v8  ;;  %v931_v18 = vpop.f32.mrf.mxu0  ;;  %v4144_v20 = vpop.f32.mrf.mxu1 }
  0xe7   :  { %v2042_v21 = vsel %vm2022_vm2, %v1840_v14, 0.0  ;;  %v932_v22 = vadd.f32 %v4090_v7, %v931_v18  ;;  %v1843_v28 = vmax.f32 %v937_v16, 0.0 }
  0xe8   :  { %v2043_v23 = vadd.f32 %v2042_v21, %v2041_v17  ;;  %v2979_v24 = vpop.f32.mrf.mxu0  ;;  %v4148_v26 = vpop.f32.mrf.mxu1 }
  0xe9   :  { %v1842_v29 = vmax.f32 %v932_v22, 0.0  ;;  %v947_v31 = vadd.f32 %v2979_v24, %v4090_v7  ;;  %v2048_v41 = vsel %vm2022_vm2, %v1843_v28, 0.0 }
  0xea   :  { %v2045_v32 = vadd.f32 %v2044_v27, %v2043_v23  ;;  %v941_v33 = vpop.f32.mrf.mxu0  ;;  %v4152_v34 = vpop.f32.mrf.mxu1 }
  0xeb   :  { %v2046_v36 = vsel %vm2022_vm2, %v1842_v29, 0.0  ;;  %v942_v37 = vadd.f32 %v4090_v7, %v941_v33  ;;  %v1845_v43 = vmax.f32 %v947_v31, 0.0 }
  0xec   :  { %v2047_v38 = vadd.f32 %v2046_v36, %v2045_v32  ;;  %v2982_v39 = vpop.f32.mrf.mxu0  ;;  %v4156_v40 = vpop.f32.mrf.mxu1 }
  0xed   :  { %v1844_v45 = vmax.f32 %v942_v37, 0.0  ;;  %v957_v46 = vadd.f32 %v2982_v39, %v4090_v7  ;;  %v2052_v57 = vsel %vm2022_vm2, %v1845_v43, 0.0 }
  0xee   :  { %v2049_v47 = vadd.f32 %v2048_v41, %v2047_v38  ;;  %v951_v49 = vpop.f32.mrf.mxu0  ;;  %v4160_v50 = vpop.f32.mrf.mxu1 }
  0xef   :  { %v2050_v51 = vsel %vm2022_vm2, %v1844_v45, 0.0  ;;  %v952_v52 = vadd.f32 %v4090_v7, %v951_v49  ;;  %v1847_v58 = vmax.f32 %v957_v46, 0.0 }
  0xf0   :  { %v2051_v53 = vadd.f32 %v2050_v51, %v2049_v47  ;;  %v2985_v54 = vpop.f32.mrf.mxu0  ;;  %v4164_v56 = vpop.f32.mrf.mxu1 }
  0xf1   :  { %v1846_v59 = vmax.f32 %v952_v52, 0.0  ;;  %v967_v61 = vadd.f32 %v2985_v54, %v4090_v7  ;;  %v2056_v8 = vsel %vm2022_vm2, %v1847_v58, 0.0 }
  0xf2   :  { %v2053_v62 = vadd.f32 %v2052_v57, %v2051_v53  ;;  %v961_v63 = vpop.f32.mrf.mxu0  ;;  %v4168_v0 = vpop.f32.mrf.mxu1 }
  0xf3   :  { %v2054_v1 = vsel %vm2022_vm2, %v1846_v59, 0.0  ;;  %v962_v2 = vadd.f32 %v4090_v7, %v961_v63  ;;  %v1849_v9 = vmax.f32 %v967_v61, 0.0 }
  0xf4   :  { %v2055_v4 = vadd.f32 %v2054_v1, %v2053_v62  ;;  %v2988_v5 = vpop.f32.mrf.mxu0  ;;  %v4172_v6 = vpop.f32.mrf.mxu1 }
  0xf5   :  { %v1848_v12 = vmax.f32 %v962_v2, 0.0  ;;  %v977_v13 = vadd.f32 %v2988_v5, %v4090_v7  ;;  %v2060_v27 = vsel %vm2022_vm2, %v1849_v9, 0.0 }
  0xf6   :  { %v2057_v14 = vadd.f32 %v2056_v8, %v2055_v4  ;;  %v971_v16 = vpop.f32.mrf.mxu0  ;;  %v4176_v17 = vpop.f32.mrf.mxu1 }
  0xf7   :  { %v2058_v18 = vsel %vm2022_vm2, %v1848_v12, 0.0  ;;  %v972_v21 = vadd.f32 %v4090_v7, %v971_v16  ;;  %v1851_v28 = vmax.f32 %v977_v13, 0.0 }
  0xf8   :  { %v2059_v22 = vadd.f32 %v2058_v18, %v2057_v14  ;;  %v2991_v23 = vpop.f32.mrf.mxu0  ;;  %v4180_v24 = vpop.f32.mrf.mxu1 }
  0xf9   :  { %v1850_v29 = vmax.f32 %v972_v21, 0.0  ;;  %v987_v31 = vadd.f32 %v2991_v23, %v4090_v7  ;;  %v2064_v45 = vsel %vm2022_vm2, %v1851_v28, 0.0 }
  0xfa   :  { %v2061_v32 = vadd.f32 %v2060_v27, %v2059_v22  ;;  %v981_v33 = vpop.f32.mrf.mxu0  ;;  %v4184_v36 = vpop.f32.mrf.mxu1 }
  0xfb   :  { %v2062_v37 = vsel %vm2022_vm2, %v1850_v29, 0.0  ;;  %v982_v38 = vadd.f32 %v4090_v7, %v981_v33  ;;  %v1853_v46 = vmax.f32 %v987_v31, 0.0 }
  0xfc   :  { %v2063_v39 = vadd.f32 %v2062_v37, %v2061_v32  ;;  %v2994_v41 = vpop.f32.mrf.mxu0  ;;  %v4188_v43 = vpop.f32.mrf.mxu1 }
  0xfd   :  { %v1852_v47 = vmax.f32 %v982_v38, 0.0  ;;  %v997_v49 = vadd.f32 %v2994_v41, %v4090_v7  ;;  %v2068_v62 = vsel %vm2022_vm2, %v1853_v46, 0.0 }
  0xfe   :  { %v2065_v51 = vadd.f32 %v2064_v45, %v2063_v39  ;;  %v991_v52 = vpop.f32.mrf.mxu0  ;;  %v4192_v53 = vpop.f32.mrf.mxu1 }
  0xff   :  { %v2066_v54 = vsel %vm2022_vm2, %v1852_v47, 0.0  ;;  %v992_v57 = vadd.f32 %v4090_v7, %v991_v52  ;;  %v1855_v63 = vmax.f32 %v997_v49, 0.0  ;;  %v2445_v47 = vld [vmem:[%s4614_s3 + $0x8] sm:$0xff] }
 0x100   :  { %v2067_v58 = vadd.f32 %v2066_v54, %v2065_v51  ;;  %v2997_v59 = vpop.f32.mrf.mxu0  ;;  %v4196_v61 = vpop.f32.mrf.mxu1  ;;  %3249 = vmatpush3.msra.mxu1 %v2445_v47 }
 0x101   :  { %v1854_v1 = vmax.f32 %v992_v57, 0.0  ;;  %v1007_v2 = vadd.f32 %v2997_v59, %v4090_v7  ;;  %v2072_v18 = vsel %vm2022_vm2, %v1855_v63, 0.0  ;;  %3250 = vmatprep.subr.mxu1 %v4618_v44 }
 0x102   :  { %v2069_v4 = vadd.f32 %v2068_v62, %v2067_v58  ;;  %v1001_v5 = vpop.f32.mrf.mxu0  ;;  %v4200_v8 = vpop.f32.mrf.mxu1 }
 0x103   :  { %v2070_v9 = vsel %vm2022_vm2, %v1854_v1, 0.0  ;;  %v1002_v12 = vadd.f32 %v4090_v7, %v1001_v5  ;;  %v1857_v21 = vmax.f32 %v1007_v2, 0.0 }
 0x104   :  { %v2071_v13 = vadd.f32 %v2070_v9, %v2069_v4  ;;  %v3000_v14 = vpop.f32.mrf.mxu0  ;;  %v4204_v16 = vpop.f32.mrf.mxu1 }
 0x105   :  { %v1856_v22 = vmax.f32 %v1002_v12, 0.0  ;;  %v1017_v23 = vadd.f32 %v3000_v14, %v4090_v7  ;;  %v2076_v41 = vsel %vm2022_vm2, %v1857_v21, 0.0 }
 0x106   :  { %v2073_v27 = vadd.f32 %v2072_v18, %v2071_v13  ;;  %v1011_v28 = vpop.f32.mrf.mxu0  ;;  %v4208_v29 = vpop.f32.mrf.mxu1 }
 0x107   :  { %v2074_v31 = vsel %vm2022_vm2, %v1856_v22, 0.0  ;;  %v1012_v32 = vadd.f32 %v4090_v7, %v1011_v28  ;;  %v1859_v37 = vmax.f32 %v1017_v23, 0.0 }
 0x108   :  { %v2075_v33 = vadd.f32 %v2074_v31, %v2073_v27  ;;  %v3003_v38 = vpop.f32.mrf.mxu0  ;;  %v4212_v39 = vpop.f32.mrf.mxu1 }
 0x109   :  { %v1858_v45 = vmax.f32 %v1012_v32, 0.0  ;;  %v1027_v46 = vadd.f32 %v3003_v38, %v4090_v7  ;;  %v2080_v59 = vsel %vm2022_vm2, %v1859_v37, 0.0 }
 0x10a   :  { %v2077_v49 = vadd.f32 %v2076_v41, %v2075_v33  ;;  %v1021_v51 = vpop.f32.mrf.mxu0  ;;  %v3150_v52 = vpop.f32.mrf.mxu1 }
 0x10b   :  { %v2078_v54 = vsel %vm2022_vm2, %v1858_v45, 0.0  ;;  %v1022_v57 = vadd.f32 %v4090_v7, %v1021_v51  ;;  %v1517_v58 = vadd.f32 %v3150_v52, %v4090_v7  ;;  %v1861_v2 = vmax.f32 %v1027_v46, 0.0 }
 0x10c   :  { %v2079_v62 = vadd.f32 %v2078_v54, %v2077_v49  ;;  %v3006_v63 = vpop.f32.mrf.mxu0  ;;  %v1511_v1 = vpop.f32.mrf.mxu1 }
 0x10d   :  { %v1860_v4 = vmax.f32 %v1022_v57, 0.0  ;;  %v1037_v5 = vadd.f32 %v3006_v63, %v4090_v7  ;;  %v1959_v9 = vmax.f32 %v1517_v58, 0.0  ;;  %v1512_v14 = vadd.f32 %v4090_v7, %v1511_v1 }
 0x10e   :  { %v2081_v12 = vadd.f32 %v2080_v59, %v2079_v62  ;;  %v1031_v13 = vpop.f32.mrf.mxu0  ;;  %v3153_v18 = vpop.f32.mrf.mxu1  ;;  %v2084_v38 = vsel %vm2022_vm2, %v1861_v2, 0.0 }
 0x10f   :  { %v2082_v21 = vsel %vm2022_vm2, %v1860_v4, 0.0  ;;  %v1863_v22 = vmax.f32 %v1037_v5, 0.0  ;;  %v1032_v23 = vadd.f32 %v4090_v7, %v1031_v13  ;;  %v2300_v31 = vsel %vm2022_vm2, %v1959_v9, 0.0 }
 0x110   :  { %v2083_v27 = vadd.f32 %v2082_v21, %v2081_v12  ;;  %v3009_v28 = vpop.f32.mrf.mxu0  ;;  %v1958_v32 = vmax.f32 %v1512_v14, 0.0  ;;  %v1527_v33 = vadd.f32 %v3153_v18, %v4090_v7  ;;  %v1521_v37 = vpop.f32.mrf.mxu1 }
 0x111   :  { %v1862_v41 = vmax.f32 %v1032_v23, 0.0  ;;  %v1047_v45 = vadd.f32 %v3009_v28, %v4090_v7  ;;  %v1522_v46 = vadd.f32 %v4090_v7, %v1521_v37  ;;  %v2093_v57 = vsel %vm2022_vm2, %v1863_v22, 0.0 }
 0x112   :  { %v2085_v47 = vadd.f32 %v2084_v38, %v2083_v27  ;;  %v1041_v49 = vpop.f32.mrf.mxu0  ;;  %v2299_v51 = vsel %vm2022_vm2, %v1958_v32, 0.0  ;;  %v1961_v52 = vmax.f32 %v1527_v33, 0.0  ;;  %v3156_v54 = vpop.f32.mrf.mxu1 }
 0x113   :  { %v2092_v58 = vsel %vm2022_vm2, %v1862_v41, 0.0  ;;  %v1042_v59 = vadd.f32 %v4090_v7, %v1041_v49  ;;  %v2301_v62 = vadd.f32 %v2300_v31, %v2299_v51  ;;  %v1960_v2 = vmax.f32 %v1522_v46, 0.0 }
 0x114   :  { %v2094_v63 = vadd.f32 %v2093_v57, %v2092_v58  ;;  %v3012_v1 = vpop.f32.mrf.mxu0  ;;  %v1531_v4 = vpop.f32.mrf.mxu1  ;;  %v1865_v5 = vmax.f32 %v1047_v45, 0.0  ;;  %v1537_v13 = vadd.f32 %v3156_v54, %v4090_v7  ;;  %v2304_v18 = vsel %vm2022_vm2, %v1961_v52, 0.0 }
 0x115   :  { %v1864_v9 = vmax.f32 %v1042_v59, 0.0  ;;  %v1057_v12 = vadd.f32 %v3012_v1, %v4090_v7  ;;  %v2302_v21 = vsel %vm2022_vm2, %v1960_v2, 0.0  ;;  %v1532_v22 = vadd.f32 %v4090_v7, %v1531_v4 }
 0x116   :  { %v1051_v14 = vpop.f32.mrf.mxu0  ;;  %v3159_v23 = vpop.f32.mrf.mxu1  ;;  %v2086_v27 = vrot.slane %v2085_v47, 4  ;;  %v2303_v32 = vadd.f32 %v2302_v21, %v2301_v62  ;;  %v1963_v41 = vmax.f32 %v1537_v13, 0.0  ;;  %v2097_v49 = vsel %vm2022_vm2, %v1865_v5, 0.0 }
 0x117   :  { %v2095_v28 = vsel %vm2022_vm2, %v1864_v9, 0.0  ;;  %v1052_v31 = vadd.f32 %v4090_v7, %v1051_v14  ;;  %v1867_v37 = vmax.f32 %v1057_v12, 0.0  ;;  %v1962_v45 = vmax.f32 %v1532_v22, 0.0 }
 0x118   :  { %v2096_v33 = vadd.f32 %v2095_v28, %v2094_v63  ;;  %v3015_v38 = vpop.f32.mrf.mxu0  ;;  %v1541_v46 = vpop.f32.mrf.mxu1  ;;  %v2305_v54 = vadd.f32 %v2304_v18, %v2303_v32  ;;  %v2308_v59 = vsel %vm2022_vm2, %v1963_v41, 0.0  ;;  %v4248_v62 = vadd.f32 %v2086_v27, %v2085_v47 }
 0x119   :  { %v1866_v51 = vmax.f32 %v1052_v31, 0.0  ;;  %v1067_v52 = vadd.f32 %v3015_v38, %v4090_v7  ;;  %v2306_v1 = vsel %vm2022_vm2, %v1962_v45, 0.0  ;;  %v2101_v5 = vsel %vm2022_vm2, %v1867_v37, 0.0 }
 0x11a   :  { %v2098_v57 = vadd.f32 %v2097_v49, %v2096_v33  ;;  %v1061_v58 = vpop.f32.mrf.mxu0  ;;  %v3162_v2 = vpop.f32.mrf.mxu1  ;;  %v2307_v9 = vadd.f32 %v2306_v1, %v2305_v54  ;;  %v1547_v14 = vadd.f32 %v3159_v23, %v4090_v7  ;;  %v1542_v18 = vadd.f32 %v4090_v7, %v1541_v46 }
 0x11b   :  { %v2099_v63 = vsel %vm2022_vm2, %v1866_v51, 0.0  ;;  %v1062_v4 = vadd.f32 %v4090_v7, %v1061_v58  ;;  %v1869_v22 = vmax.f32 %v1067_v52, 0.0  ;;  %v2088_v45 = vrot.slane %v4248_v62, 2 }
 0x11c   :  { %v2100_v12 = vadd.f32 %v2099_v63, %v2098_v57  ;;  %v3018_v13 = vpop.f32.mrf.mxu0  ;;  %v1551_v21 = vpop.f32.mrf.mxu1  ;;  %v2309_v47 = vadd.f32 %v2308_v59, %v2307_v9  ;;  %v1965_v33 = vmax.f32 %v1547_v14, 0.0  ;;  %v1964_v38 = vmax.f32 %v1542_v18, 0.0 }
 0x11d   :  { %v1868_v28 = vmax.f32 %v1062_v4, 0.0  ;;  %v1077_v31 = vadd.f32 %v3018_v13, %v4090_v7  ;;  %v1557_v23 = vadd.f32 %v3162_v2, %v4090_v7  ;;  %v2105_v59 = vsel %vm2022_vm2, %v1869_v22, 0.0 }
 0x11e   :  { %v2102_v27 = vadd.f32 %v2101_v5, %v2100_v12  ;;  %v1071_v32 = vpop.f32.mrf.mxu0  ;;  %v3165_v41 = vpop.f32.mrf.mxu1  ;;  %v2312_v54 = vsel %vm2022_vm2, %v1965_v33, 0.0  ;;  %v2310_v57 = vsel %vm2022_vm2, %v1964_v38, 0.0  ;;  %v1552_v13 = vadd.f32 %v4090_v7, %v1551_v21 }
 0x11f   :  { %v2103_v37 = vsel %vm2022_vm2, %v1868_v28, 0.0  ;;  %v1072_v49 = vadd.f32 %v4090_v7, %v1071_v32  ;;  %v1871_v51 = vmax.f32 %v1077_v31, 0.0  ;;  %v2311_v4 = vadd.f32 %v2310_v57, %v2309_v47 }
 0x120   :  { %v2104_v46 = vadd.f32 %v2103_v37, %v2102_v27  ;;  %v3021_v52 = vpop.f32.mrf.mxu0  ;;  %v1561_v58 = vpop.f32.mrf.mxu1  ;;  %v1967_v12 = vmax.f32 %v1557_v23, 0.0  ;;  %v1567_v2 = vadd.f32 %v3165_v41, %v4090_v7  ;;  %v1966_v38 = vmax.f32 %v1552_v13, 0.0 }
 0x121   :  { %v1870_v1 = vmax.f32 %v1072_v49, 0.0  ;;  %v1087_v63 = vadd.f32 %v3021_v52, %v4090_v7  ;;  %v2313_v27 = vadd.f32 %v2312_v54, %v2311_v4  ;;  %v2109_v22 = vsel %vm2022_vm2, %v1871_v51, 0.0 }
 0x122   :  { %v2106_v9 = vadd.f32 %v2105_v59, %v2104_v46  ;;  %v1081_v5 = vpop.f32.mrf.mxu0  ;;  %v3168_v14 = vpop.f32.mrf.mxu1  ;;  %v1969_v47 = vmax.f32 %v1567_v2, 0.0  ;;  %v2316_v21 = vsel %vm2022_vm2, %v1967_v12, 0.0  ;;  %v1562_v41 = vadd.f32 %v4090_v7, %v1561_v58 }
 0x123   :  { %v2107_v18 = vsel %vm2022_vm2, %v1870_v1, 0.0  ;;  %v1873_v28 = vmax.f32 %v1087_v63, 0.0  ;;  %v1082_v31 = vadd.f32 %v4090_v7, %v1081_v5  ;;  %v2314_v54 = vsel %vm2022_vm2, %v1966_v38, 0.0 }
 0x124   :  { %v2108_v32 = vadd.f32 %v2107_v18, %v2106_v9  ;;  %v3024_v33 = vpop.f32.mrf.mxu0  ;;  %v1571_v37 = vpop.f32.mrf.mxu1  ;;  %v1577_v51 = vadd.f32 %v3168_v14, %v4090_v7  ;;  %v2315_v9 = vadd.f32 %v2314_v54, %v2313_v27  ;;  %v2320_v12 = vsel %vm2022_vm2, %v1969_v47, 0.0 }
 0x125   :  { %v1872_v49 = vmax.f32 %v1082_v31, 0.0  ;;  %v1097_v23 = vadd.f32 %v3024_v33, %v4090_v7  ;;  %v2113_v46 = vsel %vm2022_vm2, %v1873_v28, 0.0  ;;  %v1968_v58 = vmax.f32 %v1562_v41, 0.0 }
 0x126   :  { %v2110_v52 = vadd.f32 %v2109_v22, %v2108_v32  ;;  %v1091_v57 = vpop.f32.mrf.mxu0  ;;  %v3171_v59 = vpop.f32.mrf.mxu1  ;;  %v1572_v2 = vadd.f32 %v4090_v7, %v1571_v37  ;;  %v2317_v22 = vadd.f32 %v2316_v21, %v2315_v9  ;;  %v1971_v14 = vmax.f32 %v1577_v51, 0.0 }
 0x127   :  { %v2111_v1 = vsel %vm2022_vm2, %v1872_v49, 0.0  ;;  %v1875_v63 = vmax.f32 %v1097_v23, 0.0  ;;  %v1092_v4 = vadd.f32 %v4090_v7, %v1091_v57  ;;  %v2318_v49 = vsel %vm2022_vm2, %v1968_v58, 0.0 }
 0x128   :  { %v2112_v5 = vadd.f32 %v2111_v1, %v2110_v52  ;;  %v3027_v13 = vpop.f32.mrf.mxu0  ;;  %v1581_v18 = vpop.f32.mrf.mxu1  ;;  %v1970_v27 = vmax.f32 %v1572_v2, 0.0  ;;  %v2319_v37 = vadd.f32 %v2318_v49, %v2317_v22  ;;  %v1587_v21 = vadd.f32 %v3171_v59, %v4090_v7 }
 0x129   :  { %v1874_v28 = vmax.f32 %v1092_v4, 0.0  ;;  %v1107_v31 = vadd.f32 %v3027_v13, %v4090_v7  ;;  %v2117_v32 = vsel %vm2022_vm2, %v1875_v63, 0.0  ;;  %v1582_v51 = vadd.f32 %v4090_v7, %v1581_v18 }
 0x12a   :  { %v2114_v33 = vadd.f32 %v2113_v46, %v2112_v5  ;;  %v1101_v38 = vpop.f32.mrf.mxu0  ;;  %v3174_v23 = vpop.f32.mrf.mxu1  ;;  %v2322_v1 = vsel %vm2022_vm2, %v1970_v27, 0.0  ;;  %v2324_v9 = vsel %vm2022_vm2, %v1971_v14, 0.0  ;;  %v2321_v5 = vadd.f32 %v2320_v12, %v2319_v37 }
 0x12b   :  { %v2115_v52 = vsel %vm2022_vm2, %v1874_v28, 0.0  ;;  %v1877_v47 = vmax.f32 %v1107_v31, 0.0  ;;  %v1102_v41 = vadd.f32 %v4090_v7, %v1101_v38  ;;  %v1973_v2 = vmax.f32 %v1587_v21, 0.0 }
 0x12c   :  { %v2116_v57 = vadd.f32 %v2115_v52, %v2114_v33  ;;  %v3030_v54 = vpop.f32.mrf.mxu0  ;;  %v1591_v46 = vpop.f32.mrf.mxu1  ;;  %v1972_v28 = vmax.f32 %v1582_v51, 0.0  ;;  %v1597_v31 = vadd.f32 %v3174_v23, %v4090_v7  ;;  %v2323_v18 = vadd.f32 %v2322_v1, %v2321_v5 }
 0x12d   :  { %v1876_v63 = vmax.f32 %v1102_v41, 0.0  ;;  %v1117_v4 = vadd.f32 %v3030_v54, %v4090_v7  ;;  %v2121_v49 = vsel %vm2022_vm2, %v1877_v47, 0.0  ;;  %v2328_v23 = vsel %vm2022_vm2, %v1973_v2, 0.0 }
 0x12e   :  { %v2118_v13 = vadd.f32 %v2117_v32, %v2116_v57  ;;  %v1111_v58 = vpop.f32.mrf.mxu0  ;;  %v3177_v22 = vpop.f32.mrf.mxu1  ;;  %v2326_v14 = vsel %vm2022_vm2, %v1972_v28, 0.0  ;;  %v1975_v12 = vmax.f32 %v1597_v31, 0.0  ;;  %v2325_v57 = vadd.f32 %v2324_v9, %v2323_v18 }
 0x12f   :  { %v2119_v33 = vsel %vm2022_vm2, %v1876_v63, 0.0  ;;  %v1879_v38 = vmax.f32 %v1117_v4, 0.0  ;;  %v1112_v59 = vadd.f32 %v4090_v7, %v1111_v58  ;;  %v1592_v1 = vadd.f32 %v4090_v7, %v1591_v46 }
 0x130   :  { %v2120_v27 = vadd.f32 %v2119_v33, %v2118_v13  ;;  %v3033_v52 = vpop.f32.mrf.mxu0  ;;  %v1601_v32 = vpop.f32.mrf.mxu1  ;;  %v1607_v47 = vadd.f32 %v3177_v22, %v4090_v7  ;;  %v2327_v58 = vadd.f32 %v2326_v14, %v2325_v57  ;;  %v2332_v2 = vsel %vm2022_vm2, %v1975_v12, 0.0 }
 0x131   :  { %v1878_v41 = vmax.f32 %v1112_v59, 0.0  ;;  %v1127_v37 = vadd.f32 %v3033_v52, %v4090_v7  ;;  %v2125_v54 = vsel %vm2022_vm2, %v1879_v38, 0.0  ;;  %v1974_v9 = vmax.f32 %v1592_v1, 0.0 }
 0x132   :  { %v2122_v21 = vadd.f32 %v2121_v49, %v2120_v27  ;;  %v1121_v51 = vpop.f32.mrf.mxu0  ;;  %v3180_v63 = vpop.f32.mrf.mxu1  ;;  %v1602_v33 = vadd.f32 %v4090_v7, %v1601_v32  ;;  %v2329_v18 = vadd.f32 %v2328_v23, %v2327_v58  ;;  %v1977_v22 = vmax.f32 %v1607_v47, 0.0 }
 0x133   :  { %v2123_v4 = vsel %vm2022_vm2, %v1878_v41, 0.0  ;;  %v1881_v5 = vmax.f32 %v1127_v37, 0.0  ;;  %v1122_v13 = vadd.f32 %v4090_v7, %v1121_v51  ;;  %v2330_v41 = vsel %vm2022_vm2, %v1974_v9, 0.0 }
 0x134   :  { %v2124_v28 = vadd.f32 %v2123_v4, %v2122_v21  ;;  %v3036_v31 = vpop.f32.mrf.mxu0  ;;  %v1611_v38 = vpop.f32.mrf.mxu1  ;;  %v1976_v14 = vmax.f32 %v1602_v33, 0.0  ;;  %v2331_v32 = vadd.f32 %v2330_v41, %v2329_v18  ;;  %v1617_v23 = vadd.f32 %v3180_v63, %v4090_v7  ;;  %v2444_v63 = vld [vmem:[%s4614_s3] sm:$0xff] }
 0x135   :  { %v1880_v59 = vmax.f32 %v1122_v13, 0.0  ;;  %v1137_v46 = vadd.f32 %v3036_v31, %v4090_v7  ;;  %v2129_v49 = vsel %vm2022_vm2, %v1881_v5, 0.0  ;;  %v1612_v47 = vadd.f32 %v4090_v7, %v1611_v38  ;;  %3251 = vmatpush3.msra.mxu1 %v2444_v63 }
 0x136   :  { %v2126_v27 = vadd.f32 %v2125_v54, %v2124_v28  ;;  %v1131_v52 = vpop.f32.mrf.mxu0  ;;  %v3183_v37 = vpop.f32.mrf.mxu1  ;;  %v2334_v4 = vsel %vm2022_vm2, %v1976_v14, 0.0  ;;  %v2336_v58 = vsel %vm2022_vm2, %v1977_v22, 0.0  ;;  %v2333_v28 = vadd.f32 %v2332_v2, %v2331_v32 }
 0x137   :  { %v2127_v57 = vsel %vm2022_vm2, %v1880_v59, 0.0  ;;  %v1883_v12 = vmax.f32 %v1137_v46, 0.0  ;;  %v1132_v21 = vadd.f32 %v4090_v7, %v1131_v52  ;;  %v1979_v33 = vmax.f32 %v1617_v23, 0.0 }
 0x138   :  { %v2128_v51 = vadd.f32 %v2127_v57, %v2126_v27  ;;  %v3039_v1 = vpop.f32.mrf.mxu0  ;;  %v1621_v54 = vpop.f32.mrf.mxu1  ;;  %v1978_v59 = vmax.f32 %v1612_v47, 0.0  ;;  %v1627_v46 = vadd.f32 %v3183_v37, %v4090_v7  ;;  %v2335_v41 = vadd.f32 %v2334_v4, %v2333_v28 }
 0x139   :  { %v1882_v5 = vmax.f32 %v1132_v21, 0.0  ;;  %v1147_v13 = vadd.f32 %v3039_v1, %v4090_v7  ;;  %v2133_v2 = vsel %vm2022_vm2, %v1883_v12, 0.0  ;;  %v2340_v14 = vsel %vm2022_vm2, %v1979_v33, 0.0 }
 0x13a   :  { %v2130_v31 = vadd.f32 %v2129_v49, %v2128_v51  ;;  %v1141_v9 = vpop.f32.mrf.mxu0  ;;  %v3186_v18 = vpop.f32.mrf.mxu1  ;;  %v2338_v37 = vsel %vm2022_vm2, %v1978_v59, 0.0  ;;  %v2337_v51 = vadd.f32 %v2336_v58, %v2335_v41  ;;  %v1981_v1 = vmax.f32 %v1627_v46, 0.0 }
 0x13b   :  { %v2131_v38 = vsel %vm2022_vm2, %v1882_v5, 0.0  ;;  %v1885_v27 = vmax.f32 %v1147_v13, 0.0  ;;  %v1142_v52 = vadd.f32 %v4090_v7, %v1141_v9  ;;  %v1622_v4 = vadd.f32 %v4090_v7, %v1621_v54 }
 0x13c   :  { %v2132_v22 = vadd.f32 %v2131_v38, %v2130_v31  ;;  %v3042_v49 = vpop.f32.mrf.mxu0  ;;  %v1631_v57 = vpop.f32.mrf.mxu1  ;;  %v1637_v12 = vadd.f32 %v3186_v18, %v4090_v7  ;;  %v2339_v33 = vadd.f32 %v2338_v37, %v2337_v51  ;;  %v2344_v54 = vsel %vm2022_vm2, %v1981_v1, 0.0 }
 0x13d   :  { %v1884_v21 = vmax.f32 %v1142_v52, 0.0  ;;  %v1157_v32 = vadd.f32 %v3042_v49, %v4090_v7  ;;  %v2137_v23 = vsel %vm2022_vm2, %v1885_v27, 0.0  ;;  %v1980_v38 = vmax.f32 %v1622_v4, 0.0 }
 0x13e   :  { %v2134_v47 = vadd.f32 %v2133_v2, %v2132_v22  ;;  %v1151_v5 = vpop.f32.mrf.mxu0  ;;  %v3189_v13 = vpop.f32.mrf.mxu1  ;;  %v1983_v58 = vmax.f32 %v1637_v12, 0.0  ;;  %v1632_v46 = vadd.f32 %v4090_v7, %v1631_v57  ;;  %v2341_v18 = vadd.f32 %v2340_v14, %v2339_v33 }
 0x13f   :  { %v2135_v28 = vsel %vm2022_vm2, %v1884_v21, 0.0  ;;  %v1887_v31 = vmax.f32 %v1157_v32, 0.0  ;;  %v1152_v9 = vadd.f32 %v4090_v7, %v1151_v5  ;;  %v2342_v21 = vsel %vm2022_vm2, %v1980_v38, 0.0 }
 0x140   :  { %v2136_v59 = vadd.f32 %v2135_v28, %v2134_v47  ;;  %v3045_v63 = vpop.f32.mrf.mxu0  ;;  %v1641_v27 = vpop.f32.mrf.mxu1  ;;  %v1982_v37 = vmax.f32 %v1632_v46, 0.0  ;;  %v2343_v57 = vadd.f32 %v2342_v21, %v2341_v18  ;;  %v2348_v5 = vsel %vm2022_vm2, %v1983_v58, 0.0 }
 0x141   :  { %v1886_v52 = vmax.f32 %v1152_v9, 0.0  ;;  %v1167_v41 = vadd.f32 %v3045_v63, %v4090_v7  ;;  %v2141_v2 = vsel %vm2022_vm2, %v1887_v31, 0.0  ;;  %v1647_v14 = vadd.f32 %v3189_v13, %v4090_v7 }
 0x142   :  { %v2138_v22 = vadd.f32 %v2137_v23, %v2136_v59  ;;  %v1161_v49 = vpop.f32.mrf.mxu0  ;;  %v3192_v32 = vpop.f32.mrf.mxu1  ;;  %v2346_v1 = vsel %vm2022_vm2, %v1982_v37, 0.0  ;;  %v1642_v23 = vadd.f32 %v4090_v7, %v1641_v27  ;;  %v2345_v59 = vadd.f32 %v2344_v54, %v2343_v57 }
 0x143   :  { %v2139_v51 = vsel %vm2022_vm2, %v1886_v52, 0.0  ;;  %v1162_v47 = vadd.f32 %v4090_v7, %v1161_v49  ;;  %v1889_v31 = vmax.f32 %v1167_v41, 0.0  ;;  %v1985_v46 = vmax.f32 %v1647_v14, 0.0 }
 0x144   :  { %v2140_v4 = vadd.f32 %v2139_v51, %v2138_v22  ;;  %v3048_v12 = vpop.f32.mrf.mxu0  ;;  %v1651_v28 = vpop.f32.mrf.mxu1  ;;  %v1984_v52 = vmax.f32 %v1642_v23, 0.0  ;;  %v1657_v58 = vadd.f32 %v3192_v32, %v4090_v7  ;;  %v2347_v21 = vadd.f32 %v2346_v1, %v2345_v59 }
 0x145   :  { %v1888_v9 = vmax.f32 %v1162_v47, 0.0  ;;  %v1177_v33 = vadd.f32 %v3048_v12, %v4090_v7  ;;  %v4346_v27 = vadd.f32 %v2088_v45, %v4248_v62  ;;  %v2145_v32 = vsel %vm2022_vm2, %v1889_v31, 0.0 }
 0x146   :  { %v2142_v63 = vadd.f32 %v2141_v2, %v2140_v4  ;;  %v1171_v38 = vpop.f32.mrf.mxu0  ;;  %v3195_v18 = vpop.f32.mrf.mxu1  ;;  %v2350_v2 = vsel %vm2022_vm2, %v1984_v52, 0.0  ;;  %v1987_v37 = vmax.f32 %v1657_v58, 0.0  ;;  %v2349_v4 = vadd.f32 %v2348_v5, %v2347_v21 }
 0x147   :  { %v2143_v22 = vsel %vm2022_vm2, %v1888_v9, 0.0  ;;  %v1891_v49 = vmax.f32 %v1177_v33, 0.0  ;;  %v1172_v13 = vadd.f32 %v4090_v7, %v1171_v38  ;;  %v2352_v1 = vsel %vm2022_vm2, %v1985_v46, 0.0 }
 0x148   :  { %v2144_v41 = vadd.f32 %v2143_v22, %v2142_v63  ;;  %v3051_v54 = vpop.f32.mrf.mxu0  ;;  %v1661_v51 = vpop.f32.mrf.mxu1  ;;  %v1652_v23 = vadd.f32 %v4090_v7, %v1651_v28  ;;  %v1667_v62 = vadd.f32 %v3195_v18, %v4090_v7  ;;  %v2351_v31 = vadd.f32 %v2350_v2, %v2349_v4 }
 0x149   :  { %v1890_v47 = vmax.f32 %v1172_v13, 0.0  ;;  %v1187_v57 = vadd.f32 %v3051_v54, %v4090_v7  ;;  %v2149_v9 = vsel %vm2022_vm2, %v1891_v49, 0.0  ;;  %v2356_v5 = vsel %vm2022_vm2, %v1987_v37, 0.0  ;;  %v4365_v37 = vld [vmem:[%s4615_s2] ss:$0 sm:$0xff] }
 0x14a   :  { %v2146_v12 = vadd.f32 %v2145_v32, %v2144_v41  ;;  %v1181_v14 = vpop.f32.mrf.mxu0  ;;  %v3198_v45 = vpop.f32.mrf.mxu1  ;;  %v1986_v52 = vmax.f32 %v1652_v23, 0.0  ;;  %v1662_v58 = vadd.f32 %v4090_v7, %v1661_v51  ;;  %v2353_v13 = vadd.f32 %v2352_v1, %v2351_v31 }
 0x14b   :  { %v2147_v33 = vsel %vm2022_vm2, %v1890_v47, 0.0  ;;  %v1182_v59 = vadd.f32 %v4090_v7, %v1181_v14  ;;  %v1893_v22 = vmax.f32 %v1187_v57, 0.0  ;;  %v1989_v54 = vmax.f32 %v1667_v62, 0.0 }
 0x14c   :  { %v2148_v63 = vadd.f32 %v2147_v33, %v2146_v12  ;;  %v3054_v38 = vpop.f32.mrf.mxu0  ;;  %v1671_v46 = vpop.f32.mrf.mxu1  ;;  %v2354_v41 = vsel %vm2022_vm2, %v1986_v52, 0.0  ;;  %v1988_v32 = vmax.f32 %v1662_v58, 0.0  ;;  %v1677_v1 = vadd.f32 %v4365_v37, %v3198_v45 }
 0x14d   :  { %v1892_v28 = vmax.f32 %v1182_v59, 0.0  ;;  %v1197_v18 = vadd.f32 %v3054_v38, %v4090_v7  ;;  %v2355_v57 = vadd.f32 %v2354_v41, %v2353_v13  ;;  %v1672_v23 = vadd.f32 %v4365_v37, %v1671_v46 }
 0x14e   :  { %v2150_v21 = vadd.f32 %v2149_v9, %v2148_v63  ;;  %v1191_v49 = vpop.f32.mrf.mxu0  ;;  %v3201_v2 = vpop.f32.mrf.mxu1  ;;  %v2358_v14 = vsel %vm2022_vm2, %v1988_v32, 0.0  ;;  %v2153_v9 = vsel %vm2022_vm2, %v1893_v22, 0.0  ;;  %v2360_v52 = vsel %vm2022_vm2, %v1989_v54, 0.0 }
 0x14f   :  { %v2151_v47 = vsel %vm2022_vm2, %v1892_v28, 0.0  ;;  %v1895_v4 = vmax.f32 %v1197_v18, 0.0  ;;  %v1192_v51 = vadd.f32 %v4365_v37, %v1191_v49  ;;  %v2357_v31 = vadd.f32 %v2356_v5, %v2355_v57 }
 0x150   :  { %v2152_v7 = vadd.f32 %v2151_v47, %v2150_v21  ;;  %v3057_v12 = vpop.f32.mrf.mxu0  ;;  %v1681_v62 = vpop.f32.mrf.mxu1  ;;  %v1991_v58 = vmax.f32 %v1677_v1, 0.0  ;;  %v1990_v28 = vmax.f32 %v1672_v23, 0.0  ;;  %v1687_v32 = vadd.f32 %v4365_v37, %v3201_v2 }
 0x151   :  { %v1894_v33 = vmax.f32 %v1192_v51, 0.0  ;;  %v1207_v59 = vadd.f32 %v4365_v37, %v3057_v12  ;;  %v2162_v13 = vsel %vm2022_vm2, %v1895_v4, 0.0  ;;  %v2359_v21 = vadd.f32 %v2358_v14, %v2357_v31 }
 0x152   :  { %v2154_v63 = vadd.f32 %v2153_v9, %v2152_v7  ;;  %v1201_v38 = vpop.f32.mrf.mxu0  ;;  %v3204_v18 = vpop.f32.mrf.mxu1  ;;  %v2369_v41 = vsel %vm2022_vm2, %v1991_v58, 0.0  ;;  %v2368_v5 = vsel %vm2022_vm2, %v1990_v28, 0.0  ;;  %v1682_v14 = vadd.f32 %v4365_v37, %v1681_v62 }
 0x153   :  { %v2161_v45 = vsel %vm2022_vm2, %v1894_v33, 0.0  ;;  %v1202_v46 = vadd.f32 %v4365_v37, %v1201_v38  ;;  %v1897_v54 = vmax.f32 %v1207_v59, 0.0  ;;  %v4381_v7 = vadd.f32 %v2360_v52, %v2359_v21 }
 0x154   :  { %v2155_v49 = vrot.slane %v2154_v63, 4  ;;  %v3060_v22 = vpop.f32.mrf.mxu0  ;;  %v1691_v47 = vpop.f32.mrf.mxu1  ;;  %v2163_v12 = vadd.f32 %v2162_v13, %v2161_v45  ;;  %v2090_v9 = vrot.slane %v4346_v27, 1  ;;  %v2370_v2 = vadd.f32 %v2369_v41, %v2368_v5 }
 0x155   :  { %v1896_v51 = vmax.f32 %v1202_v46, 0.0  ;;  %v1217_v57 = vadd.f32 %v4365_v37, %v3060_v22  ;;  %v1993_v28 = vmax.f32 %v1687_v32, 0.0  ;;  %v1992_v46 = vmax.f32 %v1682_v14, 0.0 }
 0x156   :  { %v2156_v4 = vadd.f32 %v2155_v49, %v2154_v63  ;;  %v1211_v1 = vpop.f32.mrf.mxu0  ;;  %v3207_v23 = vpop.f32.mrf.mxu1  ;;  %v2166_v63 = vsel %vm2022_vm2, %v1897_v54, 0.0  ;;  %v2091_v41 = vadd.f32 %v2090_v9, %v4346_v27 }
 0x157   :  { %v2164_v33 = vsel %vm2022_vm2, %v1896_v51, 0.0  ;;  %v1212_v31 = vadd.f32 %v4365_v37, %v1211_v1  ;;  %v1899_v13 = vmax.f32 %v1217_v57, 0.0  ;;  %v2371_v51 = vsel %vm2022_vm2, %v1992_v46, 0.0 }
 0x158   :  { %v2157_v38 = vrot.slane %v2156_v4, 2  ;;  %v2165_v59 = vadd.f32 %v2164_v33, %v2163_v12  ;;  %v3063_v58 = vpop.f32.mrf.mxu0  ;;  %v1701_v52 = vpop.f32.mrf.mxu1  ;;  %v1697_v12 = vadd.f32 %v4365_v37, %v3204_v18  ;;  %v2373_v14 = vsel %vm2022_vm2, %v1993_v28, 0.0 }
 0x159   :  { %v1898_v45 = vmax.f32 %v1212_v31, 0.0  ;;  %v1227_v62 = vadd.f32 %v4365_v37, %v3063_v58  ;;  %v2372_v33 = vadd.f32 %v2371_v51, %v2370_v2  ;;  %v2170_v31 = vsel %vm2022_vm2, %v1899_v13, 0.0 }
 0x15a   :  { %v2158_v21 = vadd.f32 %v2157_v38, %v2156_v4  ;;  %v2167_v49 = vadd.f32 %v2166_v63, %v2165_v59  ;;  %v1221_v22 = vpop.f32.mrf.mxu0  ;;  %v3210_v44 = vpop.f32.mrf.mxu1  ;;  %v1692_v63 = vadd.f32 %v4365_v37, %v1691_v47  ;;  %v1995_v2 = vmax.f32 %v1697_v12, 0.0 }
 0x15b   :  { %v2168_v5 = vsel %vm2022_vm2, %v1898_v45, 0.0  ;;  %v1222_v32 = vadd.f32 %v4365_v37, %v1221_v22  ;;  %v1901_v38 = vmax.f32 %v1227_v62, 0.0  ;;  %v2438_v45 = vmul.f32 0.00390625, %v2091_v41 }
 0x15c   :  { %v2159_v1 = vrot.slane %v2158_v21, 1  ;;  %v2169_v54 = vadd.f32 %v2168_v5, %v2167_v49  ;;  %v3066_v57 = vpop.f32.mrf.mxu0  ;;  %v1711_v4 = vpop.f32.mrf.mxu1  ;;  %v1994_v62 = vmax.f32 %v1692_v63, 0.0  ;;  %v2374_v5 = vadd.f32 %v2373_v14, %v2372_v33 }
 0x15d   :  { %v1900_v59 = vmax.f32 %v1222_v32, 0.0  ;;  %v1237_v58 = vadd.f32 %v4365_v37, %v3066_v57  ;;  %v2174_v32 = vsel %vm2022_vm2, %v1901_v38, 0.0  ;;  %v1707_v12 = vadd.f32 %v4365_v37, %v3207_v23 }
 0x15e   :  { %v2160_v27 = vadd.f32 %v2159_v1, %v2158_v21  ;;  %v2171_v9 = vadd.f32 %v2170_v31, %v2169_v54  ;;  %v1231_v46 = vpop.f32.mrf.mxu0  ;;  %v3213_v18 = vpop.f32.mrf.mxu1  ;;  %v2377_v33 = vsel %vm2022_vm2, %v1995_v2, 0.0  ;;  %v1717_v23 = vadd.f32 %v4365_v37, %v3210_v44 }
 0x15f   :  { %v2172_v49 = vsel %vm2022_vm2, %v1900_v59, 0.0  ;;  %v1232_v28 = vadd.f32 %v4365_v37, %v1231_v46  ;;  %v1903_v21 = vmax.f32 %v1237_v58, 0.0  ;;  %v2375_v59 = vsel %vm2022_vm2, %v1994_v62, 0.0 }
 0x160   :  { %v2439_v22 = vmul.f32 0.00390625, %v2160_v27  ;;  %v2173_v51 = vadd.f32 %v2172_v49, %v2171_v9  ;;  %v3069_v13 = vpop.f32.mrf.mxu0  ;;  %v1721_v57 = vpop.f32.mrf.mxu1  ;;  %v2376_v46 = vadd.f32 %v2375_v59, %v2374_v5  ;;  %v1997_v63 = vmax.f32 %v1707_v12, 0.0 }
 0x161   :  { %v1902_v1 = vmax.f32 %v1232_v28, 0.0  ;;  %v1247_v54 = vadd.f32 %v4365_v37, %v3069_v13  ;;  %v2178_v49 = vsel %vm2022_vm2, %v1903_v21, 0.0  ;;  %v1712_v44 = vadd.f32 %v4365_v37, %v1711_v4 }
 0x162   :  { %v4403_v47 = vsel %vm2461_vm3, %v2439_v22, %v2438_v45  ;;  %v2175_v41 = vadd.f32 %v2174_v32, %v2173_v51  ;;  %v1241_v31 = vpop.f32.mrf.mxu0  ;;  %v1702_v45 = vadd.f32 %v4365_v37, %v1701_v52  ;;  %v3216_v51 = vpop.f32.mrf.mxu1  ;;  %v2378_v2 = vadd.f32 %v2377_v33, %v2376_v46 }
 0x163   :  { %v2176_v27 = vsel %vm2022_vm2, %v1902_v1, 0.0  ;;  %v1905_v9 = vmax.f32 %v1247_v54, 0.0  ;;  %v1242_v14 = vadd.f32 %v4365_v37, %v1241_v31  ;;  %v2381_v52 = vsel %vm2022_vm2, %v1997_v63, 0.0 }
 0x164   :  { %v2177_v38 = vadd.f32 %v2176_v27, %v2175_v41  ;;  %v3072_v58 = vpop.f32.mrf.mxu0  ;;  %v1996_v1 = vmax.f32 %v1702_v45, 0.0  ;;  %v1999_v41 = vmax.f32 %v1717_v23, 0.0  ;;  %v1727_v12 = vadd.f32 %v4365_v37, %v3213_v18 }
 0x165   :  { %v1904_v28 = vmax.f32 %v1242_v14, 0.0  ;;  %v1257_v22 = vadd.f32 %v4365_v37, %v3072_v58  ;;  %v2182_v13 = vsel %vm2022_vm2, %v1905_v9, 0.0  ;;  %v1998_v45 = vmax.f32 %v1712_v44, 0.0 }
 0x166   :  { %v2179_v62 = vadd.f32 %v2178_v49, %v2177_v38  ;;  %v1251_v32 = vpop.f32.mrf.mxu0  ;;  %v2379_v59 = vsel %vm2022_vm2, %v1996_v1, 0.0  ;;  %v1731_v38 = vpop.f32.mrf.mxu1  ;;  %v2001_v49 = vmax.f32 %v1727_v12, 0.0  ;;  %v2385_v23 = vsel %vm2022_vm2, %v1999_v41, 0.0 }
 0x167   :  { %v2180_v54 = vsel %vm2022_vm2, %v1904_v28, 0.0  ;;  %v1252_v5 = vadd.f32 %v4365_v37, %v1251_v32  ;;  %v1907_v27 = vmax.f32 %v1257_v22, 0.0  ;;  %v2380_v33 = vadd.f32 %v2379_v59, %v2378_v2 }
 0x168   :  { %v2181_v21 = vadd.f32 %v2180_v54, %v2179_v62  ;;  %v3075_v31 = vpop.f32.mrf.mxu0  ;;  %v2383_v22 = vsel %vm2022_vm2, %v1998_v45, 0.0  ;;  %v1722_v1 = vadd.f32 %v4365_v37, %v1721_v57  ;;  %v2389_v44 = vsel %vm2022_vm2, %v2001_v49, 0.0 }
 0x169   :  { %v1906_v9 = vmax.f32 %v1252_v5, 0.0  ;;  %v1267_v14 = vadd.f32 %v4365_v37, %v3075_v31  ;;  %v2382_v62 = vadd.f32 %v2381_v52, %v2380_v33  ;;  %v2186_v2 = vsel %vm2022_vm2, %v1907_v27, 0.0 }
 0x16a   :  { %v2183_v58 = vadd.f32 %v2182_v13, %v2181_v21  ;;  %v1261_v46 = vpop.f32.mrf.mxu0  ;;  %v3219_v21 = vpop.f32.mrf.mxu1  ;;  %v2000_v41 = vmax.f32 %v1722_v1, 0.0  ;;  %v1732_v52 = vadd.f32 %v4365_v37, %v1731_v38  ;;  %v1737_v57 = vadd.f32 %v4365_v37, %v3216_v51 }
 0x16b   :  { %v2184_v63 = vsel %vm2022_vm2, %v1906_v9, 0.0  ;;  %v1262_v28 = vadd.f32 %v4365_v37, %v1261_v46  ;;  %v1909_v32 = vmax.f32 %v1267_v14, 0.0  ;;  %v2384_v5 = vadd.f32 %v2383_v22, %v2382_v62 }
 0x16c   :  { %v2185_v4 = vadd.f32 %v2184_v63, %v2183_v58  ;;  %v3078_v18 = vpop.f32.mrf.mxu0  ;;  %v2387_v45 = vsel %vm2022_vm2, %v2000_v41, 0.0  ;;  %v2002_v62 = vmax.f32 %v1732_v52, 0.0  ;;  %v1741_v38 = vpop.f32.mrf.mxu1  ;;  %v2003_v51 = vmax.f32 %v1737_v57, 0.0 }
 0x16d   :  { %v1908_v13 = vmax.f32 %v1262_v28, 0.0  ;;  %v1277_v54 = vadd.f32 %v4365_v37, %v3078_v18  ;;  %v2386_v14 = vadd.f32 %v2385_v23, %v2384_v5  ;;  %v2190_v27 = vsel %vm2022_vm2, %v1909_v32, 0.0 }
 0x16e   :  { %v2187_v31 = vadd.f32 %v2186_v2, %v2185_v4  ;;  %v1271_v59 = vpop.f32.mrf.mxu0  ;;  %v2391_v41 = vsel %vm2022_vm2, %v2002_v62, 0.0  ;;  %v3222_v52 = vpop.f32.mrf.mxu1 }
 0x16f   :  { %v2188_v12 = vsel %vm2022_vm2, %v1908_v13, 0.0  ;;  %v1272_v9 = vadd.f32 %v4365_v37, %v1271_v59  ;;  %v1911_v58 = vmax.f32 %v1277_v54, 0.0  ;;  %v2388_v28 = vadd.f32 %v2387_v45, %v2386_v14 }
 0x170   :  { %v2189_v33 = vadd.f32 %v2188_v12, %v2187_v31  ;;  %v3081_v46 = vpop.f32.mrf.mxu0  ;;  %v1742_v54 = vadd.f32 %v4365_v37, %v1741_v38  ;;  %v1751_v38 = vpop.f32.mrf.mxu1 }
 0x171   :  { %v1910_v63 = vmax.f32 %v1272_v9, 0.0  ;;  %v1287_v49 = vadd.f32 %v4365_v37, %v3081_v46  ;;  %v2194_v32 = vsel %vm2022_vm2, %v1911_v58, 0.0  ;;  %v2390_v13 = vadd.f32 %v2389_v44, %v2388_v28 }
 0x172   :  { %v2191_v4 = vadd.f32 %v2190_v27, %v2189_v33  ;;  %v1281_v18 = vpop.f32.mrf.mxu0  ;;  %v1747_v27 = vadd.f32 %v4365_v37, %v3219_v21  ;;  %v2393_v44 = vsel %vm2022_vm2, %v2003_v51, 0.0  ;;  %v2004_v45 = vmax.f32 %v1742_v54, 0.0 }
 0x173   :  { %v2192_v22 = vsel %vm2022_vm2, %v1910_v63, 0.0  ;;  %v1282_v23 = vadd.f32 %v4365_v37, %v1281_v18  ;;  %v1913_v5 = vmax.f32 %v1287_v49, 0.0  ;;  %v2392_v46 = vadd.f32 %v2391_v41, %v2390_v13  ;;  %v3225_v41 = vpop.f32.mrf.mxu1 }
 0x174   :  { %v2193_v1 = vadd.f32 %v2192_v22, %v2191_v4  ;;  %v3084_v2 = vpop.f32.mrf.mxu0  ;;  %v2005_v21 = vmax.f32 %v1747_v27, 0.0  ;;  %v2395_v51 = vsel %vm2022_vm2, %v2004_v45, 0.0  ;;  %v1752_v13 = vadd.f32 %v4365_v37, %v1751_v38 }
 0x175   :  { %v1912_v31 = vmax.f32 %v1282_v23, 0.0  ;;  %v1297_v59 = vadd.f32 %v4365_v37, %v3084_v2  ;;  %v2198_v63 = vsel %vm2022_vm2, %v1913_v5, 0.0  ;;  %v2394_v2 = vadd.f32 %v2393_v44, %v2392_v46  ;;  %v1761_v38 = vpop.f32.mrf.mxu1 }
 0x176   :  { %v2195_v12 = vadd.f32 %v2194_v32, %v2193_v1  ;;  %v1291_v9 = vpop.f32.mrf.mxu0  ;;  %v1757_v27 = vadd.f32 %v4365_v37, %v3222_v52  ;;  %v2397_v44 = vsel %vm2022_vm2, %v2005_v21, 0.0  ;;  %v2006_v45 = vmax.f32 %v1752_v13, 0.0 }
 0x177   :  { %v2196_v14 = vsel %vm2022_vm2, %v1912_v31, 0.0  ;;  %v1292_v57 = vadd.f32 %v4365_v37, %v1291_v9  ;;  %v1915_v49 = vmax.f32 %v1297_v59, 0.0  ;;  %v2396_v46 = vadd.f32 %v2395_v51, %v2394_v2 }
 0x178   :  { %v2197_v33 = vadd.f32 %v2196_v14, %v2195_v12  ;;  %v3087_v58 = vpop.f32.mrf.mxu0  ;;  %v2007_v52 = vmax.f32 %v1757_v27, 0.0  ;;  %v2399_v21 = vsel %vm2022_vm2, %v2006_v45, 0.0  ;;  %v1762_v2 = vadd.f32 %v4365_v37, %v1761_v38 }
 0x179   :  { %v1914_v28 = vmax.f32 %v1292_v57, 0.0  ;;  %v1307_v62 = vadd.f32 %v4365_v37, %v3087_v58  ;;  %v2202_v54 = vsel %vm2022_vm2, %v1915_v49, 0.0  ;;  %v1767_v27 = vadd.f32 %v4365_v37, %v3225_v41 }
 0x17a   :  { %v2199_v4 = vadd.f32 %v2198_v63, %v2197_v33  ;;  %v1301_v18 = vpop.f32.mrf.mxu0  ;;  %v2008_v45 = vmax.f32 %v1762_v2, 0.0 }
 0x17b   :  { %v2200_v22 = vsel %vm2022_vm2, %v1914_v28, 0.0  ;;  %v1302_v23 = vadd.f32 %v4365_v37, %v1301_v18  ;;  %v1917_v5 = vmax.f32 %v1307_v62, 0.0 }
 0x17c   :  { %v2201_v32 = vadd.f32 %v2200_v22, %v2199_v4  ;;  %v3090_v1 = vpop.f32.mrf.mxu0 }
 0x17d   :  { %v1916_v31 = vmax.f32 %v1302_v23, 0.0  ;;  %v1317_v59 = vadd.f32 %v4365_v37, %v3090_v1  ;;  %v2206_v63 = vsel %vm2022_vm2, %v1917_v5, 0.0 }
 0x17e   :  { %v2203_v12 = vadd.f32 %v2202_v54, %v2201_v32  ;;  %v1311_v9 = vpop.f32.mrf.mxu0  ;;  %v2398_v54 = vadd.f32 %v2397_v44, %v2396_v46  ;;  %v2401_v44 = vsel %vm2022_vm2, %v2007_v52, 0.0 }
 0x17f   :  { %v2204_v14 = vsel %vm2022_vm2, %v1916_v31, 0.0  ;;  %v1312_v57 = vadd.f32 %v4365_v37, %v1311_v9  ;;  %v1919_v49 = vmax.f32 %v1317_v59, 0.0  ;;  %v3228_v59 = vpop.f32.mrf.mxu1 }
 0x180   :  { %v2205_v33 = vadd.f32 %v2204_v14, %v2203_v12  ;;  %v3093_v58 = vpop.f32.mrf.mxu0  ;;  %v2400_v46 = vadd.f32 %v2399_v21, %v2398_v54  ;;  %v2403_v21 = vsel %vm2022_vm2, %v2008_v45, 0.0 }
 0x181   :  { %v1918_v28 = vmax.f32 %v1312_v57, 0.0  ;;  %v1327_v62 = vadd.f32 %v4365_v37, %v3093_v58  ;;  %v2210_v51 = vsel %vm2022_vm2, %v1919_v49, 0.0  ;;  %v1771_v38 = vpop.f32.mrf.mxu1 }
 0x182   :  { %v2207_v4 = vadd.f32 %v2206_v63, %v2205_v33  ;;  %v1321_v18 = vpop.f32.mrf.mxu0  ;;  %v2402_v54 = vadd.f32 %v2401_v44, %v2400_v46  ;;  %v1772_v2 = vadd.f32 %v4365_v37, %v1771_v38  ;;  %v1372_v44 = vadd.f32 %v4365_v37, %v4105_v25 }
 0x183   :  { %v2208_v22 = vsel %vm2022_vm2, %v1918_v28, 0.0  ;;  %v1322_v23 = vadd.f32 %v4365_v37, %v1321_v18  ;;  %v1921_v13 = vmax.f32 %v1327_v62, 0.0 }
 0x184   :  { %v2209_v32 = vadd.f32 %v2208_v22, %v2207_v4  ;;  %v3096_v1 = vpop.f32.mrf.mxu0  ;;  %v1362_v22 = vadd.f32 %v4365_v37, %v4097_v15  ;;  %v1367_v15 = vadd.f32 %v4365_v37, %v4094_v11  ;;  %v1777_v11 = vadd.f32 %v4365_v37, %v3228_v59 }
 0x185   :  { %v1920_v5 = vmax.f32 %v1322_v23, 0.0  ;;  %v1337_v31 = vadd.f32 %v4365_v37, %v3096_v1  ;;  %v2214_v63 = vsel %vm2022_vm2, %v1921_v13, 0.0 }
 0x186   :  { %v2211_v12 = vadd.f32 %v2210_v51, %v2209_v32  ;;  %v1331_v9 = vpop.f32.mrf.mxu0  ;;  %v2009_v32 = vmax.f32 %v1767_v27, 0.0  ;;  %v1929_v38 = vmax.f32 %v1367_v15, 0.0 }
 0x187   :  { %v2212_v14 = vsel %vm2022_vm2, %v1920_v5, 0.0  ;;  %v1332_v57 = vadd.f32 %v4365_v37, %v1331_v9  ;;  %v1923_v49 = vmax.f32 %v1337_v31, 0.0 }
 0x188   :  { %v2213_v33 = vadd.f32 %v2212_v14, %v2211_v12  ;;  %v3099_v58 = vpop.f32.mrf.mxu0  ;;  %v3231_v14 = vpop.f32.mrf.mxu1  ;;  %v2405_v45 = vsel %vm2022_vm2, %v2009_v32, 0.0  ;;  %v4619_v32 = vmov 0.0  }
 0x189   :  { %v1922_v28 = vmax.f32 %v1332_v57, 0.0  ;;  %v1347_v62 = vadd.f32 %v4365_v37, %v3099_v58  ;;  %v2218_v51 = vsel %vm2022_vm2, %v1923_v49, 0.0  ;;  %v1928_v57 = vmax.f32 %v1362_v22, 0.0  ;;  %3252 = vmatprep.mubr.msk.f32.mxu1 %vm3269_vm4, %v4619_v32 }
 0x18a   :  { %v2215_v4 = vadd.f32 %v2214_v63, %v2213_v33  ;;  %v1341_v18 = vpop.f32.mrf.mxu0  ;;  %v2404_v63 = vadd.f32 %v2403_v21, %v2402_v54  ;;  %v1382_v21 = vadd.f32 %v4365_v37, %v4112_v35 }
 0x18b   :  { %v2216_v41 = vsel %vm2022_vm2, %v1922_v28, 0.0  ;;  %v1342_v23 = vadd.f32 %v4365_v37, %v1341_v18  ;;  %v1925_v13 = vmax.f32 %v1347_v62, 0.0  ;;  %v2010_v62 = vmax.f32 %v1772_v2, 0.0  ;;  %v1781_v18 = vpop.f32.mrf.mxu1 }
 0x18c   :  { %v2217_v52 = vadd.f32 %v2216_v41, %v2215_v4  ;;  %v3102_v1 = vpop.f32.mrf.mxu0  ;;  %v2233_v22 = vsel %vm2022_vm2, %v1928_v57, 0.0  ;;  %v1377_v41 = vadd.f32 %v4365_v37, %v4100_v19  ;;  %v2406_v59 = vadd.f32 %v2405_v45, %v2404_v63 }
 0x18d   :  { %v1924_v5 = vmax.f32 %v1342_v23, 0.0  ;;  %v1357_v31 = vadd.f32 %v4365_v37, %v3102_v1  ;;  %v2222_v49 = vsel %vm2022_vm2, %v1925_v13, 0.0  ;;  %v2011_v2 = vmax.f32 %v1777_v11, 0.0  ;;  %v3234_v15 = vpop.f32.mrf.mxu1 }
 0x18e   :  { %v2219_v12 = vadd.f32 %v2218_v51, %v2217_v52  ;;  %v1351_v9 = vpop.f32.mrf.mxu0  ;;  %v1930_v52 = vmax.f32 %v1372_v44, 0.0  ;;  %v2407_v51 = vsel %vm2022_vm2, %v2010_v62, 0.0  ;;  %v1782_v13 = vadd.f32 %v4365_v37, %v1781_v18 }
 0x18f   :  { %v2220_v27 = vsel %vm2022_vm2, %v1924_v5, 0.0  ;;  %v1927_v33 = vmax.f32 %v1357_v31, 0.0  ;;  %v1352_v58 = vadd.f32 %v4365_v37, %v1351_v9  ;;  %v1387_v19 = vadd.f32 %v4365_v37, %v4108_v30  ;;  %v1791_v11 = vpop.f32.mrf.mxu1 }
 0x190   :  { %v2221_v46 = vadd.f32 %v2220_v27, %v2219_v12  ;;  %v2235_v12 = vsel %vm2022_vm2, %v1929_v38, 0.0  ;;  %v1931_v9 = vmax.f32 %v1377_v41, 0.0  ;;  %v1392_v57 = vadd.f32 %v4365_v37, %v4120_v48 }
 0x191   :  { %v1926_v28 = vmax.f32 %v1352_v58, 0.0  ;;  %v2231_v25 = vsel %vm2022_vm2, %v1927_v33, 0.0  ;;  %v2237_v27 = vsel %vm2022_vm2, %v1930_v52, 0.0  ;;  %v2408_v58 = vadd.f32 %v2407_v51, %v2406_v59  ;;  %v3237_v59 = vpop.f32.mrf.mxu1 }
 0x192   :  { %v2223_v4 = vadd.f32 %v2222_v49, %v2221_v46  ;;  %v1932_v44 = vmax.f32 %v1382_v21, 0.0  ;;  %v2409_v46 = vsel %vm2022_vm2, %v2011_v2, 0.0  ;;  %v1787_v45 = vadd.f32 %v4365_v37, %v3231_v14 }
 0x193   :  { %v2230_v23 = vsel %vm2022_vm2, %v1926_v28, 0.0  ;;  %v2012_v30 = vmax.f32 %v1782_v13, 0.0  ;;  %v1933_v63 = vmax.f32 %v1387_v19, 0.0  ;;  %v2239_v62 = vsel %vm2022_vm2, %v1931_v9, 0.0 }
 0x194   :  { %v2224_v1 = vrot.slane %v2223_v4, 4  ;;  %v2232_v54 = vadd.f32 %v2231_v25, %v2230_v23  ;;  %v1397_v48 = vadd.f32 %v4365_v37, %v4116_v42  ;;  %v1934_v38 = vmax.f32 %v1392_v57, 0.0 }
 0x195   :  { %v2410_v41 = vadd.f32 %v2409_v46, %v2408_v58  ;;  %v2241_v25 = vsel %vm2022_vm2, %v1932_v44, 0.0  ;;  %v2013_v14 = vmax.f32 %v1787_v45, 0.0  ;;  %v2411_v23 = vsel %vm2022_vm2, %v2012_v30, 0.0 }
 0x196   :  { %v2225_v5 = vadd.f32 %v2224_v1, %v2223_v4  ;;  %v2234_v31 = vadd.f32 %v2233_v22, %v2232_v54  ;;  %v1402_v4 = vadd.f32 %v4365_v37, %v4128_v60  ;;  %v1792_v32 = vadd.f32 %v4365_v37, %v1791_v11 }
 0x197   :  { %v2243_v52 = vsel %vm2022_vm2, %v1933_v63, 0.0  ;;  %v1935_v42 = vmax.f32 %v1397_v48, 0.0  ;;  %v2245_v21 = vsel %vm2022_vm2, %v1934_v38, 0.0  ;;  %v1407_v60 = vadd.f32 %v4365_v37, %v4124_v55 }
 0x198   :  { %v2226_v35 = vrot.slane %v2225_v5, 2  ;;  %v2236_v33 = vadd.f32 %v2235_v12, %v2234_v31  ;;  %v1936_v2 = vmax.f32 %v1402_v4, 0.0  ;;  %v2412_v19 = vadd.f32 %v2411_v23, %v2410_v41 }
 0x199   :  { %v2413_v31 = vsel %vm2022_vm2, %v2013_v14, 0.0  ;;  %v1797_v12 = vadd.f32 %v4365_v37, %v3234_v15  ;;  %v2014_v9 = vmax.f32 %v1792_v32, 0.0  ;;  %v2247_v55 = vsel %vm2022_vm2, %v1935_v42, 0.0 }
 0x19a   :  { %v2227_v49 = vadd.f32 %v2226_v35, %v2225_v5  ;;  %v2238_v28 = vadd.f32 %v2237_v27, %v2236_v33  ;;  %v1412_v5 = vadd.f32 %v4365_v37, %v4139_v10  ;;  %v1801_v27 = vpop.f32.mrf.mxu1  ;;  %v1937_v33 = vmax.f32 %v1407_v60, 0.0 }
 0x19b   :  { %v1417_v58 = vadd.f32 %v4365_v37, %v4132_v3  ;;  %v2249_v44 = vsel %vm2022_vm2, %v1936_v2, 0.0  ;;  %v1422_v10 = vadd.f32 %v4365_v37, %v4148_v26  ;;  %v2414_v45 = vadd.f32 %v2413_v31, %v2412_v19 }
 0x19c   :  { %v2228_v18 = vrot.slane %v2227_v49, 1  ;;  %v2240_v22 = vadd.f32 %v2239_v62, %v2238_v28  ;;  %v1938_v15 = vmax.f32 %v1412_v5, 0.0  ;;  %v2015_v30 = vmax.f32 %v1797_v12, 0.0  ;;  %v3240_v28 = vpop.f32.mrf.mxu1 }
 0x19d   :  { %v2415_v63 = vsel %vm2022_vm2, %v2014_v9, 0.0  ;;  %v2251_v11 = vsel %vm2022_vm2, %v1937_v33, 0.0  ;;  %v1939_v62 = vmax.f32 %v1417_v58, 0.0  ;;  %v1427_v3 = vadd.f32 %v4365_v37, %v4144_v20 }
 0x19e   :  { %v2229_v1 = vadd.f32 %v2228_v18, %v2227_v49  ;;  %v2242_v54 = vadd.f32 %v2241_v25, %v2240_v22  ;;  %v1940_v48 = vmax.f32 %v1422_v10, 0.0  ;;  %v1432_v26 = vadd.f32 %v4365_v37, %v4156_v40  ;;  %v1811_v23 = vpop.f32.mrf.mxu1 }
 0x19f   :  { %v2416_v4 = vadd.f32 %v2415_v63, %v2414_v45  ;;  %v2253_v18 = vsel %vm2022_vm2, %v1938_v15, 0.0  ;;  %v2417_v22 = vsel %vm2022_vm2, %v2015_v30, 0.0  ;;  %v1807_v41 = vadd.f32 %v4365_v37, %v3237_v59 }
 0x1a0   :  { %v2440_v51 = vmul.f32 0.00390625, %v2229_v1  ;;  %v2244_v13 = vadd.f32 %v2243_v52, %v2242_v54  ;;  %v2255_v32 = vsel %vm2022_vm2, %v1939_v62, 0.0  ;;  %v1941_v52 = vmax.f32 %v1427_v3, 0.0 }
 0x1a1   :  { %v1437_v20 = vadd.f32 %v4365_v37, %v4152_v34  ;;  %v2257_v1 = vsel %vm2022_vm2, %v1940_v48, 0.0  ;;  %v1942_v40 = vmax.f32 %v1432_v26, 0.0  ;;  %v2418_v42 = vadd.f32 %v2417_v22, %v2416_v4 }
 0x1a2   :  { %v2246_v57 = vadd.f32 %v2245_v21, %v2244_v13  ;;  %v4525_v35 = vsel %vm2463_vm5, %v2440_v51, %v4403_v47  ;;  %v1802_v47 = vadd.f32 %v4365_v37, %v1801_v27  ;;  %v1442_v21 = vadd.f32 %v4365_v37, %v4164_v56  ;;  %v3243_v13 = vpop.f32.mrf.mxu1 }
 0x1a3   :  { %v2017_v60 = vmax.f32 %v1807_v41, 0.0  ;;  %v1812_v2 = vadd.f32 %v4365_v37, %v1811_v23  ;;  %v2259_v19 = vsel %vm2022_vm2, %v1941_v52, 0.0  ;;  %v1943_v5 = vmax.f32 %v1437_v20, 0.0 }
 0x1a4   :  { %v2248_v46 = vadd.f32 %v2247_v55, %v2246_v57  ;;  %v2016_v25 = vmax.f32 %v1802_v47, 0.0  ;;  %v1447_v34 = vadd.f32 %v4365_v37, %v4160_v50  ;;  %v2261_v31 = vsel %vm2022_vm2, %v1942_v40, 0.0 }
 0x1a5   :  { %v1452_v12 = vadd.f32 %v4365_v37, %v4172_v6  ;;  %v1944_v57 = vmax.f32 %v1442_v21, 0.0  ;;  %v2421_v27 = vsel %vm2022_vm2, %v2017_v60, 0.0  ;;  %v1817_v55 = vadd.f32 %v4365_v37, %v3240_v28 }
 0x1a6   :  { %v2250_v49 = vadd.f32 %v2249_v44, %v2248_v46  ;;  %v2419_v59 = vsel %vm2022_vm2, %v2016_v25, 0.0  ;;  %v2018_v33 = vmax.f32 %v1812_v2, 0.0  ;;  %v1821_v44 = vpop.f32.mrf.mxu1  ;;  %v2263_v10 = vsel %vm2022_vm2, %v1943_v5, 0.0 }
 0x1a7   :  { %v2420_v56 = vadd.f32 %v2419_v59, %v2418_v42  ;;  %v1945_v46 = vmax.f32 %v1447_v34, 0.0  ;;  %v1457_v50 = vadd.f32 %v4365_v37, %v4168_v0  ;;  %v1946_v45 = vmax.f32 %v1452_v12, 0.0 }
 0x1a8   :  { %v2252_v38 = vadd.f32 %v2251_v11, %v2250_v49  ;;  %v1462_v6 = vadd.f32 %v4365_v37, %v4180_v24  ;;  %v2265_v63 = vsel %vm2022_vm2, %v1944_v57, 0.0  ;;  %v2019_v47 = vmax.f32 %v1817_v55, 0.0 }
 0x1a9   :  { %v2422_v30 = vadd.f32 %v2421_v27, %v2420_v56  ;;  %v2423_v49 = vsel %vm2022_vm2, %v2018_v33, 0.0  ;;  %v1822_v28 = vadd.f32 %v4365_v37, %v1821_v44  ;;  %v2267_v62 = vsel %vm2022_vm2, %v1945_v46, 0.0 }
 0x1aa   :  { %v2254_v14 = vadd.f32 %v2253_v18, %v2252_v38  ;;  %v1947_v3 = vmax.f32 %v1457_v50, 0.0  ;;  %v1467_v0 = vadd.f32 %v4365_v37, %v4176_v17  ;;  %v2269_v48 = vsel %vm2022_vm2, %v1946_v45, 0.0 }
 0x1ab   :  { %v1948_v26 = vmax.f32 %v1462_v6, 0.0  ;;  %v2424_v38 = vadd.f32 %v2423_v49, %v2422_v30  ;;  %v1472_v4 = vadd.f32 %v4365_v37, %v4188_v43  ;;  %v2425_v18 = vsel %vm2022_vm2, %v2019_v47, 0.0 }
 0x1ac   :  { %v2256_v54 = vadd.f32 %v2255_v32, %v2254_v14  ;;  %v1827_v22 = vadd.f32 %v4365_v37, %v3243_v13  ;;  %v2020_v41 = vmax.f32 %v1822_v28, 0.0  ;;  %v2271_v14 = vsel %vm2022_vm2, %v1947_v3, 0.0 }
 0x1ad   :  { %v1949_v23 = vmax.f32 %v1467_v0, 0.0  ;;  %v1477_v17 = vadd.f32 %v4365_v37, %v4184_v36  ;;  %v2273_v32 = vsel %vm2022_vm2, %v1948_v26, 0.0  ;;  %v2426_v52 = vadd.f32 %v2425_v18, %v2424_v38 }
 0x1ae   :  { %v2258_v51 = vadd.f32 %v2257_v1, %v2256_v54  ;;  %v1950_v1 = vmax.f32 %v1472_v4, 0.0  ;;  %v1482_v43 = vadd.f32 %v4365_v37, %v4196_v61  ;;  %v2021_v40 = vmax.f32 %v1827_v22, 0.0 }
 0x1af   :  { %v2427_v54 = vsel %vm2022_vm2, %v2020_v41, 0.0  ;;  %v2275_v21 = vsel %vm2022_vm2, %v1949_v23, 0.0  ;;  %v1951_v60 = vmax.f32 %v1477_v17, 0.0  ;;  %v1487_v59 = vadd.f32 %v4365_v37, %v4192_v53 }
 0x1b0   :  { %v2260_v9 = vadd.f32 %v2259_v19, %v2258_v51  ;;  %v2428_v2 = vadd.f32 %v2427_v54, %v2426_v52  ;;  %v2277_v51 = vsel %vm2022_vm2, %v1950_v1, 0.0  ;;  %v1952_v13 = vmax.f32 %v1482_v43, 0.0 }
 0x1b1   :  { %v1492_v19 = vadd.f32 %v4365_v37, %v4204_v16  ;;  %v2429_v61 = vsel %vm2022_vm2, %v2021_v40, 0.0  ;;  %v2279_v34 = vsel %vm2022_vm2, %v1951_v60, 0.0  ;;  %v1497_v12 = vadd.f32 %v4365_v37, %v4200_v8 }
 0x1b2   :  { %v2262_v58 = vadd.f32 %v2261_v31, %v2260_v9  ;;  %v1953_v31 = vmax.f32 %v1487_v59, 0.0  ;;  %v2430_v9 = vadd.f32 %v2429_v61, %v2428_v2  ;;  %v2281_v53 = vsel %vm2022_vm2, %v1952_v13, 0.0 }
 0x1b3   :  { %v1954_v57 = vmax.f32 %v1492_v19, 0.0  ;;  %v1502_v27 = vadd.f32 %v4365_v37, %v4212_v39  ;;  %v1955_v33 = vmax.f32 %v1497_v12, 0.0  ;;  %v2362_v44 = vrot.slane %v4381_v7, 4 }
 0x1b4   :  { %v2264_v15 = vadd.f32 %v2263_v10, %v2262_v58  ;;  %v2283_v16 = vsel %vm2022_vm2, %v1953_v31, 0.0  ;;  %v1507_v58 = vadd.f32 %v4365_v37, %v4208_v29  ;;  %v2431_v10 = vrot.slane %v2430_v9, 4 }
 0x1b5   :  { %v2285_v8 = vsel %vm2022_vm2, %v1954_v57, 0.0  ;;  %v1956_v50 = vmax.f32 %v1502_v27, 0.0  ;;  %v2287_v6 = vsel %vm2022_vm2, %v1955_v33, 0.0  ;;  %v2363_v39 = vadd.f32 %v2362_v44, %v4381_v7 }
 0x1b6   :  { %v2266_v11 = vadd.f32 %v2265_v63, %v2264_v15  ;;  %v1957_v15 = vmax.f32 %v1507_v58, 0.0  ;;  %v2432_v30 = vadd.f32 %v2431_v10, %v2430_v9 }
 0x1b7   :  { %v2289_v47 = vsel %vm2022_vm2, %v1956_v50, 0.0  ;;  %v2364_v37 = vrot.slane %v2363_v39, 2 }
 0x1b8   :  { %v2268_v24 = vadd.f32 %v2267_v62, %v2266_v11  ;;  %v2291_v29 = vsel %vm2022_vm2, %v1957_v15, 0.0  ;;  %v2433_v28 = vrot.slane %v2432_v30, 2 }
 0x1b9   :  { %v2365_v3 = vadd.f32 %v2364_v37, %v2363_v39 }
 0x1ba   :  { %v2270_v25 = vadd.f32 %v2269_v48, %v2268_v24  ;;  %v2434_v0 = vadd.f32 %v2433_v28, %v2432_v30 }
 0x1bb   :  { %v2366_v24 = vrot.slane %v2365_v3, 1 }
 0x1bc   :  { %v2272_v20 = vadd.f32 %v2271_v14, %v2270_v25  ;;  %v2435_v38 = vrot.slane %v2434_v0, 1 }
 0x1bd   :  { %v2367_v7 = vadd.f32 %v2366_v24, %v2365_v3 }
 0x1be   :  { %v2274_v42 = vadd.f32 %v2273_v32, %v2272_v20  ;;  %v2436_v22 = vadd.f32 %v2435_v38, %v2434_v0  ;;  %v2742_v20 = vld [vmem:[%s4616_s4] ss:$0 sm:$0xff] }
 0x1bf   :  { %v2442_v14 = vmul.f32 0.00390625, %v2367_v7 }
 0x1c0   :  { %v2276_v36 = vadd.f32 %v2275_v21, %v2274_v42  ;;  %v2443_v23 = vmul.f32 0.00390625, %v2436_v22 }
 0x1c2   :  { %v2278_v5 = vadd.f32 %v2277_v51, %v2276_v36 }
 0x1c4   :  { %v2280_v56 = vadd.f32 %v2279_v34, %v2278_v5 }
 0x1c6   :  { %v2282_v55 = vadd.f32 %v2281_v53, %v2280_v56 }
 0x1c8   :  { %v2284_v46 = vadd.f32 %v2283_v16, %v2282_v55 }
 0x1ca   :  { %v2286_v45 = vadd.f32 %v2285_v8, %v2284_v46 }
 0x1cc   :  { %v2288_v63 = vadd.f32 %v2287_v6, %v2286_v45 }
 0x1ce   :  { %v2290_v49 = vadd.f32 %v2289_v47, %v2288_v63 }
 0x1d0   :  { %v2292_v11 = vadd.f32 %v2291_v29, %v2290_v49 }
 0x1d2   :  { %v2293_v62 = vrot.slane %v2292_v11, 4 }
 0x1d4   :  { %v2294_v48 = vadd.f32 %v2293_v62, %v2292_v11 }
 0x1d6   :  { %v2295_v26 = vrot.slane %v2294_v48, 2 }
 0x1d8   :  { %v2296_v4 = vadd.f32 %v2295_v26, %v2294_v48 }
 0x1da   :  { %v2297_v18 = vrot.slane %v2296_v4, 1 }
 0x1dc   :  { %v2298_v41 = vadd.f32 %v2297_v18, %v2296_v4 }
 0x1de   :  { %v2441_v25 = vmul.f32 0.00390625, %v2298_v41 }
 0x1e0   :  { %v2466_v17 = vsel %vm2465_vm6, %v2441_v25, %v4525_v35 }
 0x1e1   :  { %v2468_v32 = vsel %vm2467_vm7, %v2442_v14, %v2466_v17 }
 0x1e2   :  { %v2470_v52 = vsel %vm2469_vm8, %v2443_v23, %v2468_v32 }
 0x1e3   :  { %3253 = vmatmul.mubr.msk.f32.vlgmr.msra.gmra.mxu1 %vm2022_vm2, %v2470_v52 }
 0x2a3   :  { %v2539_v1 = vpop.f32.mrf.mxu1 }
 0x2a4   :  { %v2540_v43 = vadd.f32 %v2742_v20, %v2539_v1 }
 0x2a5   :  { %v3254_v40 = vpop.f32.mrf.mxu1 }
 0x2a6   :  { %2543 = vst [vmem:[%s4617_s5] sm:$0x3f] %v2540_v43 }

</bundles_post_ra>
